<compile_context>
chip_gen: v6e
topology: v6e:2x2x1
jax: 0.10.0
libtpu: 0.0.40
codegen_flags: <defaults>
</compile_context>

<pallas_src>
import functools

import numpy as np
import jax
import jax.numpy as jnp
from jax.experimental import pallas as pl
from jax.experimental.pallas import tpu as pltpu


# ----------------------------- config -----------------------------
class DMConfig:
    num_feat = 32
    num_classes = 10
    T = 50
    beta_1 = 1e-4
    beta_T = 2e-2
    mask_p = 0.25
    condition_mask_value = -1.0
    num_channels = 1
    input_dim = (16, 16)


# ----------------------------- fused kernel -----------------------------
def _fused_ddpm_kernel(img_ref, eps_ref, sab_ref, somab_ref, emb_ref,
                       mask_ref, w1_ref, w2t_ref, b2_ref, out_ref, *, W, L):
    """One grid step = one chunk of Bc images flattened into L = Bc*H*W lanes.

    img/eps/sab/somab : (1, L)  lane-dense image, noise, per-pixel diffusion scalars
    emb_ref           : (F, L)  precomputed time/class embedding (per-image columns)
    mask_ref          : (9, L)  0/1 validity mask per 3x3 tap (zero padding, no wrap)
    w1_ref            : (F, 9)  conv1 weights, tap-minor
    w2t_ref           : (9, F)  conv2 weights, tap-major
    b2_ref (SMEM)     : (1, 1)  conv2 bias scalar
    out_ref           : (1, 128) per-chunk partial sum of squared errors
    """
    # ---- fused forward diffusion: X_t = sqrt(ab)*x + sqrt(1-ab)*eps -------------
    x_t = sab_ref[...] * img_ref[...] + somab_ref[...] * eps_ref[...]     # (1, L)

    mask = mask_ref[...]                                                   # (9, L)

    # ---- build (9, L) tap matrix: 9 lane-rolls of (1, L) + boundary masks -------
    rows = []
    for k in range(9):
        off = (k // 3 - 1) * W + (k % 3 - 1)
        rows.append(pltpu.roll(x_t, shift=(-off) % L, axis=1))
    taps = jnp.concatenate(rows, axis=0) * mask                            # (9, L)

    # ---- conv1 (3x3, 1 -> F) on the MXU, + embedding, ReLU -----------------------
    h = jnp.dot(w1_ref[...], taps, preferred_element_type=jnp.float32)     # (F, L)
    h = jnp.maximum(h + emb_ref[...], 0.0)

    # ---- conv2 (3x3, F -> 1): F-contraction on the MXU, taps via (1,L) rolls -----
    s = jnp.dot(w2t_ref[...], h, preferred_element_type=jnp.float32)       # (9, L)
    pred = jnp.zeros((1, L), jnp.float32)
    for k in range(9):
        off = (k // 3 - 1) * W + (k % 3 - 1)
        tap = pltpu.roll(s[k:k + 1, :], shift=(-off) % L, axis=1)          # (1, L)
        pred = pred + tap * mask[k:k + 1, :]
    pred = pred + b2_ref[0, 0]

    # ---- squared error -> lane-shaped partial sums (tiny final reduce on host) ---
    d = pred - eps_ref[...]
    sq = d * d                                                             # (1, L)
    part = sq[:, 0:128]
    for i in range(1, L // 128):
        part = part + sq[:, i * 128:(i + 1) * 128]
    out_ref[...] = part                                                    # (1, 128)


# ----------------------------- pallas wrapper -----------------------------
def fused_ddpm_loss(img_flat, eps_flat, sab_flat, somab_flat, emb_full,
                    masks, w1t, w2t, b2s, *, B, G, H, W, F):
    HW = H * W
    L = (B // G) * HW                    # lanes per chunk (multiple of 128 for HW=256)
    kernel = functools.partial(_fused_ddpm_kernel, W=W, L=L)
    smem = pl.BlockSpec(memory_space=pltpu.MemorySpace.SMEM)

    partials = pl.pallas_call(
        kernel,
        out_shape=jax.ShapeDtypeStruct((1, G * 128), jnp.float32),
        grid=(G,),
        in_specs=[
            pl.BlockSpec((1, L), lambda g: (0, g)),          # images  (lane dense)
            pl.BlockSpec((1, L), lambda g: (0, g)),          # epsilon (lane dense)
            pl.BlockSpec((1, L), lambda g: (0, g)),          # sqrt(alpha_bar) per pixel
            pl.BlockSpec((1, L), lambda g: (0, g)),          # sqrt(1-alpha_bar) per pixel
            pl.BlockSpec((F, L), lambda g: (0, g)),          # time/class embedding
            pl.BlockSpec((9, L), lambda g: (0, 0)),          # tap validity masks
            pl.BlockSpec((F, 9), lambda g: (0, 0)),          # conv1 weights
            pl.BlockSpec((9, F), lambda g: (0, 0)),          # conv2 weights
            smem,                                            # conv2 bias scalar
        ],
        out_specs=pl.BlockSpec((1, 128), lambda g: (0, g)),
        compiler_params=pltpu.CompilerParams(
            dimension_semantics=("parallel",)),              # safe: no cross-step state
    )(img_flat, eps_flat, sab_flat, somab_flat, emb_full, masks, w1t, w2t, b2s)

    return jnp.sum(partials) / float(B * HW)


# ----------------------------- host-side glue -----------------------------
def _num_tensorcores():
    """Best-effort TensorCore count of the local chip (1 on v5e/v6e, 2 on v7x)."""
    n = 1
    try:
        n = int(getattr(pltpu.get_tpu_info(), 'num_cores', 1) or 1)
    except Exception:
        n = 1
    if n <= 1:
        try:
            n = int(getattr(jax.devices()[0], 'num_cores', 1) or 1)
        except Exception:
            n = 1
    return max(1, min(2, n))


def precompute_scheduler(cfg):
    betas = jnp.linspace(cfg.beta_1, cfg.beta_T, cfg.T, dtype=jnp.float32)
    alphas = 1.0 - betas
    return {
        'betas': betas,
        'alphas': alphas,
        'sqrt_betas': jnp.sqrt(betas),
        'oneover_sqrt_alphas': 1.0 / jnp.sqrt(alphas),
        'alpha_bars': jnp.cumprod(alphas),
    }


def init_params(key, F, NC):
    k0, k1, k2, k3 = jax.random.split(key, 4)
    return {
        'w1': jax.random.normal(k0, (9, F), jnp.float32) / 3.0,        # conv1 taps
        'b1': jnp.zeros((F,), jnp.float32),
        'wt': jax.random.normal(k1, (F,), jnp.float32),                # time embedding
        'bt': jnp.zeros((F,), jnp.float32),
        'wc': jax.random.normal(k2, (NC, F), jnp.float32) / jnp.sqrt(float(NC)),
        'bc': jnp.zeros((F,), jnp.float32),
        'w2': jax.random.normal(k3, (9, F), jnp.float32) / jnp.sqrt(9.0 * F),
        'b2': jnp.zeros((), jnp.float32),
    }


def build_tap_masks(Bc, H, W):
    """0/1 masks per 3x3 tap for 'same' zero-padded conv on the flattened chunk."""
    HW = H * W
    y = np.tile(np.repeat(np.arange(H), W), Bc)
    x = np.tile(np.tile(np.arange(W), H), Bc)
    m = np.zeros((9, Bc * HW), np.float32)
    for k in range(9):
        sy, sx = k // 3 - 1, k % 3 - 1
        valid = (y + sy >= 0) & (y + sy < H) & (x + sx >= 0) & (x + sx < W)
        m[k] = valid.astype(np.float32)
    return jnp.asarray(m)


def conditional_ddpm_forward(params, sched, images_nchw, conditions, key, cfg):
    B = int(conditions.shape[0])
    H, W = cfg.input_dim
    HW = H * W
    F, NC, T = cfg.num_feat, cfg.num_classes, cfg.T
    assert cfg.num_channels == 1

    # grid chunks = # TensorCores; extra serial grid steps are pure overhead.
    G = _num_tensorcores()
    if B % G != 0:
        G = 1

    k_mask, k_t, k_eps = jax.random.split(key, 3)

    # one-hot conditions + unconditional (CFG) masking
    # TODO(synk): reference uses python random.sample; jax.random.permutation is used.
    cond_oh = jax.nn.one_hot(conditions, NC, dtype=jnp.float32)
    n_uncond = int(cfg.mask_p * B)
    if n_uncond > 0:
        uncond_idx = jax.random.permutation(k_mask, B)[:n_uncond]
        cond_oh = cond_oh.at[uncond_idx].set(cfg.condition_mask_value)

    # timesteps, noise and scheduler gather (host-side glue, identical to the spec)
    times = jax.random.randint(k_t, (B,), 1, T + 1)
    eps = jax.random.normal(k_eps, (B, cfg.num_channels, H, W), jnp.float32)
    alpha_bar = sched['alpha_bars'][times - 1]
    sab = jnp.sqrt(alpha_bar)
    somab = jnp.sqrt(1.0 - alpha_bar)
    t_norm = times.astype(jnp.float32) / T

    # hoisted per-image scalar / embedding expansion (XLA-side layout plumbing)
    sab_flat = jnp.repeat(sab, HW)[None, :]                              # (1, B*HW)
    somab_flat = jnp.repeat(somab, HW)[None, :]                          # (1, B*HW)
    bias = params['b1'] + params['bt'] + params['bc']                    # (F,)
    emb_cols = (bias[:, None]
                + params['wt'][:, None] * t_norm[None, :]
                + jnp.transpose(params['wc']) @ jnp.transpose(cond_oh))  # (F, B)
    emb_full = jnp.repeat(emb_cols, HW, axis=1)                          # (F, B*HW)

    # NCHW with C=1 -> lane-dense flat layout (pure reshape, no transpose)
    img_flat = images_nchw.astype(jnp.float32).reshape(1, B * HW)
    eps_flat = eps.reshape(1, B * HW)

    w1t = jnp.transpose(params['w1'])                                    # (F, 9)
    w2t = params['w2']                                                   # (9, F)
    b2s = params['b2'].reshape(1, 1)
    masks = build_tap_masks(B // G, H, W)

    return fused_ddpm_loss(img_flat, eps_flat, sab_flat, somab_flat, emb_full,
                           masks, w1t, w2t, b2s, B=B, G=G, H=H, W=W, F=F)


# ----------------------------- main -----------------------------
if __name__ == "__main__":
    cfg = DMConfig()
    key = jax.random.PRNGKey(0)
    k_param, k_img, k_cond, k_fwd = jax.random.split(key, 4)

    B = 4
    H, W = cfg.input_dim
    images = jax.random.normal(k_img, (B, cfg.num_channels, H, W), jnp.float32)
    conditions = jax.random.randint(k_cond, (B,), 0, cfg.num_classes)

    params = init_params(k_param, cfg.num_feat, cfg.num_classes)
    sched = precompute_scheduler(cfg)

    loss = conditional_ddpm_forward(params, sched, images, conditions, k_fwd, cfg)
    jax.block_until_ready(loss)
    assert loss.shape == () and bool(jnp.isfinite(loss))
    print("KERNEL_OK")
</pallas_src>

<mosaic_0001>
module attributes {stable_mosaic.version = 11 : i64} {
  func.func @_fused_ddpm_kernel(%arg0: i32, %arg1: memref<1x1024xf32, #tpu.memory_space<vmem>>, %arg2: memref<1x1024xf32, #tpu.memory_space<vmem>>, %arg3: memref<1x1024xf32, #tpu.memory_space<vmem>>, %arg4: memref<1x1024xf32, #tpu.memory_space<vmem>>, %arg5: memref<32x1024xf32, #tpu.memory_space<vmem>>, %arg6: memref<9x1024xf32, #tpu.memory_space<vmem>>, %arg7: memref<32x9xf32, #tpu.memory_space<vmem>>, %arg8: memref<9x32xf32, #tpu.memory_space<vmem>>, %arg9: memref<1x1xf32, #tpu.memory_space<smem>>, %arg10: memref<1x128xf32, #tpu.memory_space<vmem>>) attributes {dimension_semantics = [#tpu.dimension_semantics<parallel>], iteration_bounds = array<i64: 1>, scalar_prefetch = 0 : i64, scratch_operands = 0 : i64, tpu.core_type = #tpu.core_type<tc>, window_params = [{transform_indices = @transform_0, window_bounds = array<i64: 1, 1024>}, {transform_indices = @transform_1, window_bounds = array<i64: 1, 1024>}, {transform_indices = @transform_2, window_bounds = array<i64: 1, 1024>}, {transform_indices = @transform_3, window_bounds = array<i64: 1, 1024>}, {transform_indices = @transform_4, window_bounds = array<i64: 32, 1024>}, {pipeline_mode = #tpu.pipeline_mode<synchronous>, transform_indices = @transform_5, window_bounds = array<i64: 9, 1024>}, {pipeline_mode = #tpu.pipeline_mode<synchronous>, transform_indices = @transform_6, window_bounds = array<i64: 32, 9>}, {pipeline_mode = #tpu.pipeline_mode<synchronous>, transform_indices = @transform_7, window_bounds = array<i64: 9, 32>}, {transform_indices = @transform_8, window_bounds = array<i64: 1, 1>}, {transform_indices = @transform_9, window_bounds = array<i64: 1, 128>}]} {
    %c0 = arith.constant 0 : index
    %c0_0 = arith.constant 0 : index
    %0 = vector.load %arg3[%c0, %c0_0] : memref<1x1024xf32, #tpu.memory_space<vmem>>, vector<1x1024xf32>
    %c0_1 = arith.constant 0 : index
    %c0_2 = arith.constant 0 : index
    %1 = vector.load %arg1[%c0_1, %c0_2] : memref<1x1024xf32, #tpu.memory_space<vmem>>, vector<1x1024xf32>
    %2 = arith.mulf %0, %1 : vector<1x1024xf32>
    %c0_3 = arith.constant 0 : index
    %c0_4 = arith.constant 0 : index
    %3 = vector.load %arg4[%c0_3, %c0_4] : memref<1x1024xf32, #tpu.memory_space<vmem>>, vector<1x1024xf32>
    %c0_5 = arith.constant 0 : index
    %c0_6 = arith.constant 0 : index
    %4 = vector.load %arg2[%c0_5, %c0_6] : memref<1x1024xf32, #tpu.memory_space<vmem>>, vector<1x1024xf32>
    %5 = arith.mulf %3, %4 : vector<1x1024xf32>
    %6 = arith.addf %2, %5 : vector<1x1024xf32>
    %c0_7 = arith.constant 0 : index
    %c0_8 = arith.constant 0 : index
    %7 = vector.load %arg6[%c0_7, %c0_8] : memref<9x1024xf32, #tpu.memory_space<vmem>>, vector<9x1024xf32>
    %c17_i32 = arith.constant 17 : i32
    %8 = tpu.dynamic_rotate %6 by %c17_i32 dim 1 : vector<1x1024xf32>, i32 -> vector<1x1024xf32>
    %c16_i32 = arith.constant 16 : i32
    %9 = tpu.dynamic_rotate %6 by %c16_i32 dim 1 : vector<1x1024xf32>, i32 -> vector<1x1024xf32>
    %c15_i32 = arith.constant 15 : i32
    %10 = tpu.dynamic_rotate %6 by %c15_i32 dim 1 : vector<1x1024xf32>, i32 -> vector<1x1024xf32>
    %c1_i32 = arith.constant 1 : i32
    %11 = tpu.dynamic_rotate %6 by %c1_i32 dim 1 : vector<1x1024xf32>, i32 -> vector<1x1024xf32>
    %c0_i32 = arith.constant 0 : i32
    %12 = tpu.dynamic_rotate %6 by %c0_i32 dim 1 : vector<1x1024xf32>, i32 -> vector<1x1024xf32>
    %c1023_i32 = arith.constant 1023 : i32
    %13 = tpu.dynamic_rotate %6 by %c1023_i32 dim 1 : vector<1x1024xf32>, i32 -> vector<1x1024xf32>
    %c1009_i32 = arith.constant 1009 : i32
    %14 = tpu.dynamic_rotate %6 by %c1009_i32 dim 1 : vector<1x1024xf32>, i32 -> vector<1x1024xf32>
    %c1008_i32 = arith.constant 1008 : i32
    %15 = tpu.dynamic_rotate %6 by %c1008_i32 dim 1 : vector<1x1024xf32>, i32 -> vector<1x1024xf32>
    %c1007_i32 = arith.constant 1007 : i32
    %16 = tpu.dynamic_rotate %6 by %c1007_i32 dim 1 : vector<1x1024xf32>, i32 -> vector<1x1024xf32>
    %17 = tpu.concatenate %8, %9, %10, %11, %12, %13, %14, %15, %16 in 0 : vector<1x1024xf32>, vector<1x1024xf32>, vector<1x1024xf32>, vector<1x1024xf32>, vector<1x1024xf32>, vector<1x1024xf32>, vector<1x1024xf32>, vector<1x1024xf32>, vector<1x1024xf32> -> vector<9x1024xf32>
    %18 = arith.mulf %17, %7 : vector<9x1024xf32>
    %c0_9 = arith.constant 0 : index
    %c0_10 = arith.constant 0 : index
    %19 = vector.load %arg7[%c0_9, %c0_10] : memref<32x9xf32, #tpu.memory_space<vmem>>, vector<32x9xf32>
    %cst = arith.constant dense<0.000000e+00> : vector<32x1024xf32>
    %20 = tpu.matmul %19, %18, %cst {dimension_numbers = #tpu.dot_dimension_numbers<[1], [0], [0], [1], [0, 0, 1, 1], [], []>} : vector<32x9xf32>, vector<9x1024xf32>, vector<32x1024xf32> -> vector<32x1024xf32>
    %c0_11 = arith.constant 0 : index
    %c0_12 = arith.constant 0 : index
    %21 = vector.load %arg5[%c0_11, %c0_12] : memref<32x1024xf32, #tpu.memory_space<vmem>>, vector<32x1024xf32>
    %22 = arith.addf %20, %21 : vector<32x1024xf32>
    %cst_13 = arith.constant 0.000000e+00 : f32
    %23 = vector.broadcast %cst_13 : f32 to vector<32x1024xf32>
    %24 = arith.maximumf %22, %23 : vector<32x1024xf32>
    %c0_14 = arith.constant 0 : index
    %c0_15 = arith.constant 0 : index
    %25 = vector.load %arg8[%c0_14, %c0_15] : memref<9x32xf32, #tpu.memory_space<vmem>>, vector<9x32xf32>
    %cst_16 = arith.constant dense<0.000000e+00> : vector<9x1024xf32>
    %26 = tpu.matmul %25, %24, %cst_16 {dimension_numbers = #tpu.dot_dimension_numbers<[1], [0], [0], [1], [0, 0, 1, 1], [], []>} : vector<9x32xf32>, vector<32x1024xf32>, vector<9x1024xf32> -> vector<9x1024xf32>
    %cst_17 = arith.constant 0.000000e+00 : f32
    %27 = vector.broadcast %cst_17 : f32 to vector<1x1024xf32>
    %28 = vector.extract_strided_slice %26 {offsets = [0, 0], sizes = [1, 1024], strides = [1, 1]} : vector<9x1024xf32> to vector<1x1024xf32>
    %c17_i32_18 = arith.constant 17 : i32
    %29 = tpu.dynamic_rotate %28 by %c17_i32_18 dim 1 : vector<1x1024xf32>, i32 -> vector<1x1024xf32>
    %30 = vector.extract_strided_slice %7 {offsets = [0, 0], sizes = [1, 1024], strides = [1, 1]} : vector<9x1024xf32> to vector<1x1024xf32>
    %31 = arith.mulf %29, %30 : vector<1x1024xf32>
    %32 = arith.addf %27, %31 : vector<1x1024xf32>
    %33 = vector.extract_strided_slice %26 {offsets = [1, 0], sizes = [1, 1024], strides = [1, 1]} : vector<9x1024xf32> to vector<1x1024xf32>
    %c16_i32_19 = arith.constant 16 : i32
    %34 = tpu.dynamic_rotate %33 by %c16_i32_19 dim 1 : vector<1x1024xf32>, i32 -> vector<1x1024xf32>
    %35 = vector.extract_strided_slice %7 {offsets = [1, 0], sizes = [1, 1024], strides = [1, 1]} : vector<9x1024xf32> to vector<1x1024xf32>
    %36 = arith.mulf %34, %35 : vector<1x1024xf32>
    %37 = arith.addf %32, %36 : vector<1x1024xf32>
    %38 = vector.extract_strided_slice %26 {offsets = [2, 0], sizes = [1, 1024], strides = [1, 1]} : vector<9x1024xf32> to vector<1x1024xf32>
    %c15_i32_20 = arith.constant 15 : i32
    %39 = tpu.dynamic_rotate %38 by %c15_i32_20 dim 1 : vector<1x1024xf32>, i32 -> vector<1x1024xf32>
    %40 = vector.extract_strided_slice %7 {offsets = [2, 0], sizes = [1, 1024], strides = [1, 1]} : vector<9x1024xf32> to vector<1x1024xf32>
    %41 = arith.mulf %39, %40 : vector<1x1024xf32>
    %42 = arith.addf %37, %41 : vector<1x1024xf32>
    %43 = vector.extract_strided_slice %26 {offsets = [3, 0], sizes = [1, 1024], strides = [1, 1]} : vector<9x1024xf32> to vector<1x1024xf32>
    %c1_i32_21 = arith.constant 1 : i32
    %44 = tpu.dynamic_rotate %43 by %c1_i32_21 dim 1 : vector<1x1024xf32>, i32 -> vector<1x1024xf32>
    %45 = vector.extract_strided_slice %7 {offsets = [3, 0], sizes = [1, 1024], strides = [1, 1]} : vector<9x1024xf32> to vector<1x1024xf32>
    %46 = arith.mulf %44, %45 : vector<1x1024xf32>
    %47 = arith.addf %42, %46 : vector<1x1024xf32>
    %48 = vector.extract_strided_slice %26 {offsets = [4, 0], sizes = [1, 1024], strides = [1, 1]} : vector<9x1024xf32> to vector<1x1024xf32>
    %c0_i32_22 = arith.constant 0 : i32
    %49 = tpu.dynamic_rotate %48 by %c0_i32_22 dim 1 : vector<1x1024xf32>, i32 -> vector<1x1024xf32>
    %50 = vector.extract_strided_slice %7 {offsets = [4, 0], sizes = [1, 1024], strides = [1, 1]} : vector<9x1024xf32> to vector<1x1024xf32>
    %51 = arith.mulf %49, %50 : vector<1x1024xf32>
    %52 = arith.addf %47, %51 : vector<1x1024xf32>
    %53 = vector.extract_strided_slice %26 {offsets = [5, 0], sizes = [1, 1024], strides = [1, 1]} : vector<9x1024xf32> to vector<1x1024xf32>
    %c1023_i32_23 = arith.constant 1023 : i32
    %54 = tpu.dynamic_rotate %53 by %c1023_i32_23 dim 1 : vector<1x1024xf32>, i32 -> vector<1x1024xf32>
    %55 = vector.extract_strided_slice %7 {offsets = [5, 0], sizes = [1, 1024], strides = [1, 1]} : vector<9x1024xf32> to vector<1x1024xf32>
    %56 = arith.mulf %54, %55 : vector<1x1024xf32>
    %57 = arith.addf %52, %56 : vector<1x1024xf32>
    %58 = vector.extract_strided_slice %26 {offsets = [6, 0], sizes = [1, 1024], strides = [1, 1]} : vector<9x1024xf32> to vector<1x1024xf32>
    %c1009_i32_24 = arith.constant 1009 : i32
    %59 = tpu.dynamic_rotate %58 by %c1009_i32_24 dim 1 : vector<1x1024xf32>, i32 -> vector<1x1024xf32>
    %60 = vector.extract_strided_slice %7 {offsets = [6, 0], sizes = [1, 1024], strides = [1, 1]} : vector<9x1024xf32> to vector<1x1024xf32>
    %61 = arith.mulf %59, %60 : vector<1x1024xf32>
    %62 = arith.addf %57, %61 : vector<1x1024xf32>
    %63 = vector.extract_strided_slice %26 {offsets = [7, 0], sizes = [1, 1024], strides = [1, 1]} : vector<9x1024xf32> to vector<1x1024xf32>
    %c1008_i32_25 = arith.constant 1008 : i32
    %64 = tpu.dynamic_rotate %63 by %c1008_i32_25 dim 1 : vector<1x1024xf32>, i32 -> vector<1x1024xf32>
    %65 = vector.extract_strided_slice %7 {offsets = [7, 0], sizes = [1, 1024], strides = [1, 1]} : vector<9x1024xf32> to vector<1x1024xf32>
    %66 = arith.mulf %64, %65 : vector<1x1024xf32>
    %67 = arith.addf %62, %66 : vector<1x1024xf32>
    %68 = vector.extract_strided_slice %26 {offsets = [8, 0], sizes = [1, 1024], strides = [1, 1]} : vector<9x1024xf32> to vector<1x1024xf32>
    %c1007_i32_26 = arith.constant 1007 : i32
    %69 = tpu.dynamic_rotate %68 by %c1007_i32_26 dim 1 : vector<1x1024xf32>, i32 -> vector<1x1024xf32>
    %70 = vector.extract_strided_slice %7 {offsets = [8, 0], sizes = [1, 1024], strides = [1, 1]} : vector<9x1024xf32> to vector<1x1024xf32>
    %71 = arith.mulf %69, %70 : vector<1x1024xf32>
    %72 = arith.addf %67, %71 : vector<1x1024xf32>
    %c0_27 = arith.constant 0 : index
    %c0_28 = arith.constant 0 : index
    %73 = memref.load %arg9[%c0_27, %c0_28] : memref<1x1xf32, #tpu.memory_space<smem>>
    %74 = vector.broadcast %73 : f32 to vector<1x1024xf32>
    %75 = arith.addf %72, %74 : vector<1x1024xf32>
    %c0_29 = arith.constant 0 : index
    %c0_30 = arith.constant 0 : index
    %76 = vector.load %arg2[%c0_29, %c0_30] : memref<1x1024xf32, #tpu.memory_space<vmem>>, vector<1x1024xf32>
    %77 = arith.subf %75, %76 : vector<1x1024xf32>
    %78 = arith.mulf %77, %77 : vector<1x1024xf32>
    %79 = vector.extract_strided_slice %78 {offsets = [0, 0], sizes = [1, 128], strides = [1, 1]} : vector<1x1024xf32> to vector<1x128xf32>
    %80 = vector.extract_strided_slice %78 {offsets = [0, 128], sizes = [1, 128], strides = [1, 1]} : vector<1x1024xf32> to vector<1x128xf32>
    %81 = arith.addf %79, %80 : vector<1x128xf32>
    %82 = vector.extract_strided_slice %78 {offsets = [0, 256], sizes = [1, 128], strides = [1, 1]} : vector<1x1024xf32> to vector<1x128xf32>
    %83 = arith.addf %81, %82 : vector<1x128xf32>
    %84 = vector.extract_strided_slice %78 {offsets = [0, 384], sizes = [1, 128], strides = [1, 1]} : vector<1x1024xf32> to vector<1x128xf32>
    %85 = arith.addf %83, %84 : vector<1x128xf32>
    %86 = vector.extract_strided_slice %78 {offsets = [0, 512], sizes = [1, 128], strides = [1, 1]} : vector<1x1024xf32> to vector<1x128xf32>
    %87 = arith.addf %85, %86 : vector<1x128xf32>
    %88 = vector.extract_strided_slice %78 {offsets = [0, 640], sizes = [1, 128], strides = [1, 1]} : vector<1x1024xf32> to vector<1x128xf32>
    %89 = arith.addf %87, %88 : vector<1x128xf32>
    %90 = vector.extract_strided_slice %78 {offsets = [0, 768], sizes = [1, 128], strides = [1, 1]} : vector<1x1024xf32> to vector<1x128xf32>
    %91 = arith.addf %89, %90 : vector<1x128xf32>
    %92 = vector.extract_strided_slice %78 {offsets = [0, 896], sizes = [1, 128], strides = [1, 1]} : vector<1x1024xf32> to vector<1x128xf32>
    %93 = arith.addf %91, %92 : vector<1x128xf32>
    %c0_31 = arith.constant 0 : index
    %c0_32 = arith.constant 0 : index
    %94 = vector.load %arg10[%c0_31, %c0_32] : memref<1x128xf32, #tpu.memory_space<vmem>>, vector<1x128xf32>
    tpu.vector_store %arg10[%c0_31, %c0_32], %93 {strides = array<i32>} : memref<1x128xf32, #tpu.memory_space<vmem>>, vector<1x128xf32>,
    return
  }
  func.func @transform_0(%arg0: i32) -> (i32, i32) {
    %c0_i32 = arith.constant 0 : i32
    %c0_i32_0 = arith.constant 0 : i32
    return %c0_i32, %arg0 : i32, i32
  }
  func.func @transform_1(%arg0: i32) -> (i32, i32) {
    %c0_i32 = arith.constant 0 : i32
    %c0_i32_0 = arith.constant 0 : i32
    return %c0_i32, %arg0 : i32, i32
  }
  func.func @transform_2(%arg0: i32) -> (i32, i32) {
    %c0_i32 = arith.constant 0 : i32
    %c0_i32_0 = arith.constant 0 : i32
    return %c0_i32, %arg0 : i32, i32
  }
  func.func @transform_3(%arg0: i32) -> (i32, i32) {
    %c0_i32 = arith.constant 0 : i32
    %c0_i32_0 = arith.constant 0 : i32
    return %c0_i32, %arg0 : i32, i32
  }
  func.func @transform_4(%arg0: i32) -> (i32, i32) {
    %c0_i32 = arith.constant 0 : i32
    %c0_i32_0 = arith.constant 0 : i32
    return %c0_i32, %arg0 : i32, i32
  }
  func.func @transform_5(%arg0: i32) -> (i32, i32) {
    %c0_i32 = arith.constant 0 : i32
    %c0_i32_0 = arith.constant 0 : i32
    %c0_i32_1 = arith.constant 0 : i32
    return %c0_i32, %c0_i32_0 : i32, i32
  }
  func.func @transform_6(%arg0: i32) -> (i32, i32) {
    %c0_i32 = arith.constant 0 : i32
    %c0_i32_0 = arith.constant 0 : i32
    %c0_i32_1 = arith.constant 0 : i32
    return %c0_i32, %c0_i32_0 : i32, i32
  }
  func.func @transform_7(%arg0: i32) -> (i32, i32) {
    %c0_i32 = arith.constant 0 : i32
    %c0_i32_0 = arith.constant 0 : i32
    %c0_i32_1 = arith.constant 0 : i32
    return %c0_i32, %c0_i32_0 : i32, i32
  }
  func.func @transform_8(%arg0: i32) -> (i32, i32) {
    %c0_i32 = arith.constant 0 : i32
    %c0_i32_0 = arith.constant 0 : i32
    %c0_i32_1 = arith.constant 0 : i32
    return %c0_i32, %c0_i32_0 : i32, i32
  }
  func.func @transform_9(%arg0: i32) -> (i32, i32) {
    %c0_i32 = arith.constant 0 : i32
    %c0_i32_0 = arith.constant 0 : i32
    return %c0_i32, %arg0 : i32, i32
  }
}

</mosaic_0001>

<bundles_post_ra>
// kernel: tpu_custom_call.1
= control target key start
LH: loop header
LB: loop body
LE: loop exit
PB: predicated region body
PF: predicated region fallthrough
CT: control target
= control target key end

     0   :  { %15 = vsyncpa [#allocation4], 0  ;;  %s3491_s0 = inlined_call_operand.vmem [shape: f32[1,1024], index: 0, kind: input, shape index: {}]   ;;  %s3492_s1 = inlined_call_operand.vmem [shape: f32[1,1024], index: 1, kind: input, shape index: {}]   ;;  %s3493_s2 = inlined_call_operand.vmem [shape: f32[1,1024], index: 2, kind: input, shape index: {}]   ;;  %s3494_s3 = inlined_call_operand.vmem [shape: f32[1,1024], index: 3, kind: input, shape index: {}]   ;;  %s3495_s4 = inlined_call_operand.hbm [shape: f32[32,1024], index: 4, kind: input, shape index: {}]   ;;  %s3496_s5 = inlined_call_operand.hbm [shape: f32[9,1024], index: 5, kind: input, shape index: {}]   ;;  %s3497_s6 = inlined_call_operand.vmem [shape: f32[32,9], index: 6, kind: input, shape index: {}]   ;;  %s3498_s7 = inlined_call_operand.vmem [shape: f32[9,32], index: 7, kind: input, shape index: {}]   ;;  %s3499_s8 = inlined_call_operand.<no memory space> [shape: f32[1,1], index: 8, kind: input, shape index: {}]   ;;  %s3500_s9 = inlined_call_operand.hbm [shape: f32[1,128], index: 9, kind: output, shape index: {}]  }
   0x1   :  { %16 = vsyncpa [#allocation7], 0 }
   0x2   :  { %17 = vsyncpa [#allocation5], 0  ;;  %s2141_s30 = smov [#allocation3]  }
   0x3   :  { %s31_s10 = sshll.u32 %s2141_s30, 4  ;;  %s32_s10 = int_to_ptr.vmem [resolvable:$true] %s31_s10 }
   0x4   :  { %s2083_s11 = scalar_lea.vmem %s32_s10, 4096  ;;  %p2088_p1 = scmp.lt.s32.totalorder %s32_s10, %s32_s10 }
   0x5   :  { %p2084_p0 = scmp.ne.s32.totalorder %s32_s10, %s2083_s11  ;;  %p2089_p2 = scmp.lt.s32.totalorder %s2083_s11, %s2083_s11 }
   0x7   :  { %p2090_p3 = por %p2089_p2, %p2088_p1 }
   0x9   :  { %p2091_p4 = pnand %p2090_p3, %p2084_p0 }
   0xb   :  { %2094 = shalt.err (!%p2091_p4)
}
   0xc   :  { %s2142_s12 = smov 1024   ;;  %s2143_s13 = smov 64  }
   0xd   :  { %37 = dma.hbm_to_vmem [thread:$0]  %s3495_s4, 4096, %s32_s10, [#allocation4], %s2142_s12, %s2142_s12, %s2143_s13  }
   0xe   :  { %s2144_s16 = smov [#allocation6]  }
   0xf   :  { %s43_s17 = sshll.u32 %s2144_s16, 4  ;;  %s44_s17 = int_to_ptr.vmem [resolvable:$true] %s43_s17 }
  0x10   :  { %s2103_s18 = scalar_lea.vmem %s44_s17, 2048  ;;  %p2108_p6 = scmp.lt.s32.totalorder %s44_s17, %s44_s17 }
  0x11   :  { %p2104_p5 = scmp.ne.s32.totalorder %s44_s17, %s2103_s18  ;;  %p2109_p7 = scmp.lt.s32.totalorder %s2103_s18, %s2103_s18 }
  0x13   :  { %p2110_p8 = por %p2109_p7, %p2108_p6 }
  0x15   :  { %p2111_p9 = pnand %p2110_p8, %p2104_p5 }
  0x17   :  { %2114 = shalt.err (!%p2111_p9)
}
  0x18   :  { %49 = dma.hbm_to_vmem [thread:$0]  %s3496_s5, 2048, %s44_s17, [#allocation7], %s2142_s12, %s2142_s12, %s2143_s13  }
  0x19   :  { %2135 = dma.done.wait [#allocation4], 4096  }
  0x1a   :  { %2136 = vsyncadd [#allocation4], 4294963200 }
  0x1b   :  { %2137 = dma.done.wait [#allocation7], 2048  }
  0x1c   :  { %2138 = vsyncadd [#allocation7], 4294965248  ;;  %v86_v0 = vlaneseq  ;;  %v62_v2 = vld [vmem:[%s3493_s2] sm:$0xff]  ;;  %s2146_s2 = smov 15   ;;  %s2148_s27 = smov 1   ;;  %v2153_v21 = vmov 0.0  }
  0x1d   :  { %v63_v3 = vld [vmem:[%s3491_s0] sm:$0xff]  ;;  %s2145_s0 = smov 16   ;;  %s2149_s28 = smov 127   ;;  %793 = vmatprep.mubr.f32.mxu1 %v2153_v21  ;;  %704 = vmatprep.mubr.f32.mxu0 %v2153_v21  ;;  %vm488_vm4 = vcmask 1040384   ;;  %vm497_vm6 = vcmask 1041408   ;;  %vm506_vm7 = vcmask 1042432  }
  0x1e   :  { %v2212_v1 = vshrl.u32 %v86_v0, 7  ;;  %v65_v4 = vld [vmem:[%s3494_s3] sm:$0xff]  ;;  %v64_v5 = vmul.f32 %v63_v3, %v62_v2  ;;  %s2147_s3 = smov 17   ;;  %s2150_s29 = smov 113   ;;  %v2425_v40 = vand.u32 127, %v86_v0  ;;  %vm515_vm10 = vcmask 1043456  }
  0x1f   :  { %v66_v6 = vld [vmem:[%s3492_s1] sm:$0xff]  ;;  %s2151_s30 = smov 112   ;;  %s2152_s10 = smov 111   ;;  %vm524_vm12 = vcmask 1044480   ;;  %vm533_vm13 = vcmask 1045504   ;;  %vm542_vm14 = vcmask 1046528  }
  0x20   :  { %v67_v7 = vmul.f32 %v66_v6, %v65_v4  ;;  %v96_v8 = vsub.s32 2, %v2212_v1  ;;  %v92_v9 = vsub.s32 1, %v2212_v1  ;;  %v3505_v11 = vsub.s32 3, %v2212_v1 }
  0x21   :  { %v3504_v15 = vsub.s32 4, %v2212_v1  ;;  %v3506_v17 = vsub.s32 0, %v2212_v1  ;;  %v3501_v19 = vsub.s32 7, %v2212_v1  ;;  %v3502_v22 = vsub.s32 6, %v2212_v1 }
  0x22   :  { %v2228_v10 = vadd.f32 %v67_v7, %v64_v5  ;;  %v3503_v24 = vsub.s32 5, %v2212_v1  ;;  %vm169_vm0 = vcmp.lt.s32.totalorder %v2425_v40, 16  ;;  %vm144_vm1 = vcmp.lt.s32.totalorder %v2425_v40, 17 }
  0x23   :  { %vm219_vm2 = vcmp.lt.s32.totalorder %v2425_v40, 1  ;;  %vm194_vm3 = vcmp.lt.s32.totalorder %v2425_v40, 15  ;;  %vm244_vm5 = vcmp.lt.s32.totalorder %v2425_v40, 127  ;;  %vm269_vm8 = vcmp.lt.s32.totalorder %v2425_v40, 113 }
  0x24   :  { %v2234_v12 = vrot.slane %v2228_v10, %v96_v8  ;;  %v2239_v13 = vrot.slane %v2228_v10, %v92_v9  ;;  %v2248_v14 = vrot.slane %v2228_v10, %v3505_v11  ;;  %v2274_v16 = vrot.slane %v2228_v10, %v3504_v15 }
  0x25   :  { %v2300_v18 = vrot.slane %v2228_v10, %v3506_v17  ;;  %v2310_v20 = vrot.slane %v2228_v10, %v3501_v19  ;;  %v2346_v23 = vrot.slane %v2228_v10, %v3502_v22  ;;  %v2356_v25 = vrot.slane %v2228_v10, %v3503_v24 }
  0x26   :  { %157 = vrot.lane.b32.xlu0 %v2234_v12, %s2145_s0  ;;  %155 = vrot.lane.b32.xlu1 %v2239_v13, %s2145_s0  ;;  %vm294_vm9 = vcmp.lt.s32.totalorder %v2425_v40, 112  ;;  %v403_v63 = vrot.slane %v2248_v14, 4  ;;  %v402_v10 = vrot.slane %v2234_v12, 4  ;;  %vm319_vm11 = vcmp.lt.s32.totalorder %v2425_v40, 111 }
  0x27   :  { %vm603_vm15 = vcmask 72704  }
  0x2a   :  { %159 = vrot.lane.b32.xlu0 %v2248_v14, %s2145_s0  ;;  %182 = vrot.lane.b32.xlu1 %v2234_v12, %s2146_s2 }
  0x2e   :  { %184 = vrot.lane.b32.xlu0 %v2248_v14, %s2146_s2  ;;  %130 = vrot.lane.b32.xlu1 %v2234_v12, %s2147_s3 }
  0x32   :  { %132 = vrot.lane.b32.xlu0 %v2248_v14, %s2147_s3  ;;  %180 = vrot.lane.b32.xlu1 %v2239_v13, %s2146_s2 }
  0x36   :  { %207 = vrot.lane.b32.xlu0 %v2234_v12, %s2148_s27  ;;  %209 = vrot.lane.b32.xlu1 %v2248_v14, %s2148_s27 }
  0x3a   :  { %128 = vrot.lane.b32.xlu0 %v2239_v13, %s2147_s3  ;;  %205 = vrot.lane.b32.xlu1 %v2239_v13, %s2148_s27 }
  0x3e   :  { %234 = vrot.lane.b32.xlu0 %v2248_v14, %s2149_s28  ;;  %236 = vrot.lane.b32.xlu1 %v2274_v16, %s2149_s28 }
  0x42   :  { %232 = vrot.lane.b32.xlu0 %v2234_v12, %s2149_s28  ;;  %259 = vrot.lane.b32.xlu1 %v2248_v14, %s2150_s29 }
  0x46   :  { %261 = vrot.lane.b32.xlu0 %v2274_v16, %s2150_s29  ;;  %257 = vrot.lane.b32.xlu1 %v2234_v12, %s2150_s29 }
  0x4a   :  { %284 = vrot.lane.b32.xlu0 %v2248_v14, %s2151_s30  ;;  %286 = vrot.lane.b32.xlu1 %v2274_v16, %s2151_s30 }
  0x4e   :  { %282 = vrot.lane.b32.xlu0 %v2234_v12, %s2151_s30  ;;  %309 = vrot.lane.b32.xlu1 %v2248_v14, %s2152_s10 }
  0x52   :  { %311 = vrot.lane.b32.xlu0 %v2274_v16, %s2152_s10  ;;  %153 = vrot.lane.b32.xlu1 %v2300_v18, %s2145_s0 }
  0x56   :  { %307 = vrot.lane.b32.xlu0 %v2234_v12, %s2152_s10  ;;  %167 = vrot.lane.b32.xlu1 %v2310_v20, %s2145_s0 }
  0x5a   :  { %178 = vrot.lane.b32.xlu0 %v2300_v18, %s2146_s2  ;;  %126 = vrot.lane.b32.xlu1 %v2300_v18, %s2147_s3 }
  0x5e   :  { %192 = vrot.lane.b32.xlu0 %v2310_v20, %s2146_s2  ;;  %203 = vrot.lane.b32.xlu1 %v2300_v18, %s2148_s27 }
  0x62   :  { %140 = vrot.lane.b32.xlu0 %v2310_v20, %s2147_s3  ;;  %217 = vrot.lane.b32.xlu1 %v2310_v20, %s2148_s27 }
  0x66   :  { %230 = vrot.lane.b32.xlu0 %v2239_v13, %s2149_s28  ;;  %228 = vrot.lane.b32.xlu1 %v2300_v18, %s2149_s28 }
  0x6a   :  { %255 = vrot.lane.b32.xlu0 %v2239_v13, %s2150_s29  ;;  %253 = vrot.lane.b32.xlu1 %v2300_v18, %s2150_s29 }
  0x6e   :  { %280 = vrot.lane.b32.xlu0 %v2239_v13, %s2151_s30  ;;  %278 = vrot.lane.b32.xlu1 %v2300_v18, %s2151_s30 }
  0x72   :  { %305 = vrot.lane.b32.xlu0 %v2239_v13, %s2152_s10  ;;  %165 = vrot.lane.b32.xlu1 %v2346_v23, %s2145_s0 }
  0x76   :  { %303 = vrot.lane.b32.xlu0 %v2300_v18, %s2152_s10  ;;  %163 = vrot.lane.b32.xlu1 %v2356_v25, %s2145_s0 }
  0x7a   :  { %190 = vrot.lane.b32.xlu0 %v2346_v23, %s2146_s2  ;;  %138 = vrot.lane.b32.xlu1 %v2346_v23, %s2147_s3 }
  0x7e   :  { %188 = vrot.lane.b32.xlu0 %v2356_v25, %s2146_s2  ;;  %215 = vrot.lane.b32.xlu1 %v2346_v23, %s2148_s27 }
  0x82   :  { %136 = vrot.lane.b32.xlu0 %v2356_v25, %s2147_s3  ;;  %213 = vrot.lane.b32.xlu1 %v2356_v25, %s2148_s27 }
  0x86   :  { %242 = vrot.lane.b32.xlu0 %v2310_v20, %s2149_s28  ;;  %240 = vrot.lane.b32.xlu1 %v2346_v23, %s2149_s28 }
  0x8a   :  { %267 = vrot.lane.b32.xlu0 %v2310_v20, %s2150_s29  ;;  %265 = vrot.lane.b32.xlu1 %v2346_v23, %s2150_s29 }
  0x8e   :  { %292 = vrot.lane.b32.xlu0 %v2310_v20, %s2151_s30  ;;  %290 = vrot.lane.b32.xlu1 %v2346_v23, %s2151_s30 }
  0x92   :  { %317 = vrot.lane.b32.xlu0 %v2310_v20, %s2152_s10  ;;  %161 = vrot.lane.b32.xlu1 %v2274_v16, %s2145_s0 }
  0x96   :  { %315 = vrot.lane.b32.xlu0 %v2346_v23, %s2152_s10  ;;  %186 = vrot.lane.b32.xlu1 %v2274_v16, %s2146_s2 }
  0x98   :  { %v158_v26 = vpop.permute.xlu0 %157  ;;  %v2394_v27 = vpop.permute.xlu1 %155 }
  0x99   :  { %v175_v43 = vsel %vm169_vm0, %v2394_v27, %v158_v26 }
  0x9a   :  { %134 = vrot.lane.b32.xlu0 %v2274_v16, %s2147_s3  ;;  %211 = vrot.lane.b32.xlu1 %v2274_v16, %s2148_s27  ;;  %v338_v48 = vrot.slane %v175_v43, 7 }
  0x9c   :  { %v2400_v28 = vpop.permute.xlu0 %159  ;;  %v183_v29 = vpop.permute.xlu1 %182 }
  0x9d   :  { %v174_v46 = vsel %vm169_vm0, %v158_v26, %v2400_v28 }
  0x9e   :  { %238 = vrot.lane.b32.xlu0 %v2356_v25, %s2149_s28  ;;  %263 = vrot.lane.b32.xlu1 %v2356_v25, %s2150_s29  ;;  %v339_v52 = vrot.slane %v174_v46, 7  ;;  %v80_v46 = vld [vmem:[#allocation6 + $0x58] sm:$0x1] }
  0xa0   :  { %v2406_v30 = vpop.permute.xlu0 %184  ;;  %v131_v31 = vpop.permute.xlu1 %130 }
  0xa1   :  { %v199_v53 = vsel %vm194_vm3, %v183_v29, %v2406_v30 }
  0xa2   :  { %288 = vrot.lane.b32.xlu0 %v2356_v25, %s2151_s30  ;;  %313 = vrot.lane.b32.xlu1 %v2356_v25, %s2152_s10  ;;  %v363_v61 = vrot.slane %v199_v53, 6 }
  0xa4   :  { %v2412_v32 = vpop.permute.xlu0 %132  ;;  %v2414_v33 = vpop.permute.xlu1 %180 }
  0xa5   :  { %v149_v49 = vsel %vm144_vm1, %v131_v31, %v2412_v32  ;;  %v200_v50 = vsel %vm194_vm3, %v2414_v33, %v183_v29 }
  0xa6   :  { %v492_v58 = vsel %vm488_vm4, %v149_v49, %v339_v52  ;;  %v362_v59 = vrot.slane %v200_v50, 6 }
  0xa7   :  { %v501_v7 = vsel %vm497_vm6, %v492_v58, %v363_v61  ;;  %v79_v58 = vld [vmem:[#allocation6 + $0x50] sm:$0x1] }
  0xa8   :  { %v208_v34 = vpop.permute.xlu0 %207  ;;  %v2416_v35 = vpop.permute.xlu1 %209 }
  0xa9   :  { %v224_v51 = vsel %vm219_vm2, %v208_v34, %v2416_v35 }
  0xaa   :  { %v387_v60 = vrot.slane %v224_v51, 5 }
  0xac   :  { %v2418_v36 = vpop.permute.xlu0 %128  ;;  %v2420_v37 = vpop.permute.xlu1 %205  ;;  %v510_v29 = vsel %vm506_vm7, %v501_v7, %v387_v60 }
  0xad   :  { %v150_v47 = vsel %vm144_vm1, %v2418_v36, %v131_v31  ;;  %v225_v54 = vsel %vm219_vm2, %v2420_v37, %v208_v34  ;;  %v519_v50 = vsel %vm515_vm10, %v510_v29, %v403_v63 }
  0xae   :  { %v491_v57 = vsel %vm488_vm4, %v150_v47, %v338_v48  ;;  %v386_v62 = vrot.slane %v225_v54, 5 }
  0xaf   :  { %v500_v2 = vsel %vm497_vm6, %v491_v57, %v362_v59 }
  0xb0   :  { %v235_v38 = vpop.permute.xlu0 %234  ;;  %v2422_v39 = vpop.permute.xlu1 %236 }
  0xb1   :  { %v248_v0 = vsel %vm244_vm5, %v235_v38, %v2422_v39 }
  0xb2   :  { %v427_v31 = vrot.slane %v248_v0, 3 }
  0xb4   :  { %v2427_v41 = vpop.permute.xlu0 %232  ;;  %v260_v42 = vpop.permute.xlu1 %259  ;;  %v528_v53 = vsel %vm524_vm12, %v519_v50, %v427_v31  ;;  %v2520_v31 = vld [vmem:[%s3497_s6] sm:$0xff] }
  0xb5   :  { %v249_v3 = vsel %vm244_vm5, %v2427_v41, %v235_v38  ;;  %v509_v38 = vsel %vm506_vm7, %v500_v2, %v386_v62  ;;  %v72_v62 = vld [vmem:[#allocation6 + $0x18] sm:$0xff] }
  0xb6   :  { %v426_v12 = vrot.slane %v249_v3, 3  ;;  %v518_v54 = vsel %vm515_vm10, %v509_v38, %v402_v10  ;;  %v71_v3 = vld [vmem:[#allocation6 + $0x10] sm:$0xff]  ;;  %v2530_v38 = vld [vmem:[%s3497_s6 + $0x8] sm:$0xff] }
  0xb8   :  { %v2435_v44 = vpop.permute.xlu0 %261  ;;  %v2437_v45 = vpop.permute.xlu1 %257  ;;  %v527_v57 = vsel %vm524_vm12, %v518_v54, %v426_v12 }
  0xb9   :  { %v273_v4 = vsel %vm269_vm8, %v260_v42, %v2435_v44  ;;  %v274_v14 = vsel %vm269_vm8, %v2437_v45, %v260_v42 }
  0xba   :  { %v451_v43 = vrot.slane %v273_v4, 2  ;;  %v450_v42 = vrot.slane %v274_v14, 2 }
  0xbc   :  { %v285_v55 = vpop.permute.xlu0 %284  ;;  %v2462_v56 = vpop.permute.xlu1 %286  ;;  %v537_v59 = vsel %vm533_vm13, %v528_v53, %v451_v43  ;;  %v536_v0 = vsel %vm533_vm13, %v527_v57, %v450_v42 }
  0xbd   :  { %v298_v26 = vsel %vm294_vm9, %v285_v55, %v2462_v56 }
  0xbe   :  { %v475_v47 = vrot.slane %v298_v26, 1 }
  0xc0   :  { %v2479_v5 = vpop.permute.xlu0 %282  ;;  %v310_v6 = vpop.permute.xlu1 %309  ;;  %v546_v63 = vsel %vm542_vm14, %v537_v59, %v475_v47 }
  0xc1   :  { %v299_v34 = vsel %vm294_vm9, %v2479_v5, %v285_v55  ;;  %v554_v10 = vmul.f32 %v546_v63, %v72_v62 }
  0xc2   :  { %v474_v51 = vrot.slane %v299_v34, 1 }
  0xc4   :  { %v2495_v48 = vpop.permute.xlu0 %311  ;;  %v154_v49 = vpop.permute.xlu1 %153  ;;  %v545_v4 = vsel %vm542_vm14, %v536_v0, %v474_v51  ;;  %v2555_v51 = vld [vmem:[%s3497_s6 + $0x18] sm:$0xff] }
  0xc5   :  { %v323_v52 = vsel %vm319_vm11, %v310_v6, %v2495_v48  ;;  %v553_v29 = vmul.f32 %v545_v4, %v71_v3 }
  0xc6   :  { %v562_v55 = vmul.f32 %v323_v52, %v80_v46  ;;  %v2542_v46 = vld [vmem:[%s3497_s6 + $0x10] sm:$0xff]  ;;  %v176_v52 = vsel %vm169_vm0, %v154_v49, %v2394_v27 }
  0xc8   :  { %v2505_v60 = vpop.permute.xlu0 %307  ;;  %2018 = vmatprep.subr.msk.mxu1 %vm488_vm4, %v562_v55  ;;  %v2508_v61 = vpop.permute.xlu1 %167 }
  0xc9   :  { %v324_v2 = vsel %vm319_vm11, %v2505_v60, %v310_v6  ;;  %v177_v42 = vsel %vm169_vm0, %v2508_v61, %v154_v49 }
  0xca   :  { %v561_v7 = vmul.f32 %v324_v2, %v79_v58  ;;  %v336_v55 = vrot.slane %v177_v42, 7  ;;  %v401_v42 = vrot.slane %v2239_v13, 4 }
  0xcc   :  { %2019 = vmatpush1.msk.msra.mxu1 %vm488_vm4, %v561_v7  ;;  %v179_v14 = vpop.permute.xlu0 %178  ;;  %v127_v26 = vpop.permute.xlu1 %126 }
  0xcd   :  { %759 = vmatprep.subr.mxu1 %v554_v10  ;;  %v201_v53 = vsel %vm194_vm3, %v179_v14, %v2414_v33  ;;  %v151_v57 = vsel %vm144_vm1, %v127_v26, %v2418_v36  ;;  %v337_v33 = vrot.slane %v176_v52, 7 }
  0xce   :  { %760 = vmatpush1.msra.mxu1 %v553_v29  ;;  %v361_v36 = vrot.slane %v201_v53, 6 }
  0xcf   :  { %2020 = vmatmul.mubr.msk.f32.vlgmr.msra.gmra.mxu1 %vm603_vm15, %v2520_v31  ;;  %v490_v0 = vsel %vm488_vm4, %v151_v57, %v337_v33 }
  0xd0   :  { %v2524_v6 = vpop.permute.xlu0 %192  ;;  %v204_v34 = vpop.permute.xlu1 %203  ;;  %799 = vmatprep.mubr.f32.mxu1 %v2153_v21 }
  0xd1   :  { %v202_v58 = vsel %vm194_vm3, %v2524_v6, %v179_v14  ;;  %v226_v27 = vsel %vm219_vm2, %v204_v34, %v2420_v37 }
  0xd2   :  { %v360_v2 = vrot.slane %v202_v58, 6  ;;  %v385_v37 = vrot.slane %v226_v27, 5  ;;  %v78_v58 = vld [vmem:[#allocation6 + $0x48] sm:$0x1] }
  0xd3   :  { %2021 = vmatmul.mubr.msk.f32.gmra.mxu1 %vm603_vm15, %v2530_v38 }
  0xd4   :  { %v2534_v12 = vpop.permute.xlu0 %140  ;;  %v2536_v43 = vpop.permute.xlu1 %217  ;;  %805 = vmatprep.mubr.f32.mxu1 %v2153_v21 }
  0xd5   :  { %v152_v54 = vsel %vm144_vm1, %v2534_v12, %v127_v26  ;;  %v227_v49 = vsel %vm219_vm2, %v2536_v43, %v204_v34  ;;  %v499_v34 = vsel %vm497_vm6, %v490_v0, %v361_v36 }
  0xd6   :  { %v489_v63 = vsel %vm488_vm4, %v152_v54, %v336_v55  ;;  %v384_v3 = vrot.slane %v227_v49, 5 }
  0xd7   :  { %2022 = vmatmul.mubr.msk.f32.gmra.mxu1 %vm603_vm15, %v2542_v46  ;;  %v498_v7 = vsel %vm497_vm6, %v489_v63, %v360_v2 }
  0xd8   :  { %v231_v47 = vpop.permute.xlu0 %230  ;;  %v2549_v50 = vpop.permute.xlu1 %228  ;;  %811 = vmatprep.mubr.f32.mxu1 %v2153_v21  ;;  %v507_v55 = vsel %vm506_vm7, %v498_v7, %v384_v3 }
  0xd9   :  { %v250_v4 = vsel %vm244_vm5, %v231_v47, %v2427_v41  ;;  %v251_v10 = vsel %vm244_vm5, %v2549_v50, %v231_v47  ;;  %v508_v47 = vsel %vm506_vm7, %v499_v34, %v385_v37 }
  0xda   :  { %v425_v53 = vrot.slane %v250_v4, 3  ;;  %v424_v13 = vrot.slane %v251_v10, 3  ;;  %v77_v4 = vld [vmem:[#allocation6 + $0x40] sm:$0x1] }
  0xdb   :  { %2023 = vmatmul.mubr.msk.f32.gmra.mxu1 %vm603_vm15, %v2555_v51 }
  0xdc   :  { %v256_v59 = vpop.permute.xlu0 %255  ;;  %v2580_v62 = vpop.permute.xlu1 %253  ;;  %971 = vmatprep.mubr.f32.mxu1 %v2153_v21 }
  0xdd   :  { %v275_v14 = vsel %vm269_vm8, %v256_v59, %v2437_v45  ;;  %v276_v41 = vsel %vm269_vm8, %v2580_v62, %v256_v59  ;;  %v400_v45 = vrot.slane %v2300_v18, 4 }
  0xde   :  { %v449_v57 = vrot.slane %v275_v14, 2  ;;  %v448_v27 = vrot.slane %v276_v41, 2 }
  0xdf   :  { %v516_v0 = vsel %vm515_vm10, %v507_v55, %v400_v45 }
  0xe0   :  { %v281_v26 = vpop.permute.xlu0 %280  ;;  %v2595_v29 = vpop.permute.xlu1 %278  ;;  %v525_v37 = vsel %vm524_vm12, %v516_v0, %v424_v13 }
  0xe1   :  { %v300_v52 = vsel %vm294_vm9, %v281_v26, %v2479_v5  ;;  %v301_v54 = vsel %vm294_vm9, %v2595_v29, %v281_v26  ;;  %v517_v5 = vsel %vm515_vm10, %v508_v47, %v401_v42  ;;  %v534_v7 = vsel %vm533_vm13, %v525_v37, %v448_v27  ;;  %v2625_v26 = vld [vmem:[#allocation6 + $0x8] sm:$0xff]  ;;  %v69_v42 = vld [vmem:[#allocation6] sm:$0xff] }
  0xe2   :  { %v473_v33 = vrot.slane %v300_v52, 1  ;;  %v472_v36 = vrot.slane %v301_v54, 1  ;;  %v526_v63 = vsel %vm524_vm12, %v517_v5, %v425_v53 }
  0xe3   :  { %v535_v3 = vsel %vm533_vm13, %v526_v63, %v449_v57 }
  0xe4   :  { %v306_v49 = vpop.permute.xlu0 %305  ;;  %v166_v59 = vpop.permute.xlu1 %165  ;;  %v543_v41 = vsel %vm542_vm14, %v534_v7, %v472_v36 }
  0xe5   :  { %v325_v18 = vsel %vm319_vm11, %v306_v49, %v2505_v60  ;;  %v544_v60 = vsel %vm542_vm14, %v535_v3, %v473_v33  ;;  %v551_v54 = vmul.f32 %v543_v41, %v69_v42  ;;  %v170_v63 = vsel %vm169_vm0, %v166_v59, %v2508_v61 }
  0xe6   :  { %v560_v2 = vmul.f32 %v325_v18, %v78_v58  ;;  %v552_v47 = vmul.f32 %v544_v60, %v2625_v26  ;;  %v343_v61 = vrot.slane %v170_v63, 7 }
  0xe8   :  { %2012 = vmatprep.subr.msk.mxu0 %vm488_vm4, %v560_v2  ;;  %v2621_v10 = vpop.permute.xlu0 %303  ;;  %v2623_v14 = vpop.permute.xlu1 %163 }
  0xe9   :  { %v326_v34 = vsel %vm319_vm11, %v2621_v10, %v306_v49  ;;  %v171_v57 = vsel %vm169_vm0, %v2623_v14, %v166_v59 }
  0xea   :  { %v559_v52 = vmul.f32 %v326_v34, %v77_v4  ;;  %v342_v33 = vrot.slane %v171_v57, 7 }
  0xec   :  { %2013 = vmatpush1.msk.msra.mxu0 %vm488_vm4, %v559_v52  ;;  %v191_v53 = vpop.permute.xlu0 %190  ;;  %v139_v45 = vpop.permute.xlu1 %138  ;;  %v406_v52 = vrot.slane %v2346_v23, 4  ;;  %v407_v23 = vrot.slane %v2310_v20, 4 }
  0xed   :  { %670 = vmatprep.subr.mxu0 %v552_v47  ;;  %v195_v37 = vsel %vm194_vm3, %v191_v53, %v2524_v6  ;;  %v145_v4 = vsel %vm144_vm1, %v139_v45, %v2534_v12 }
  0xee   :  { %671 = vmatpush1.msra.mxu0 %v551_v54  ;;  %v367_v6 = vrot.slane %v195_v37, 6  ;;  %v496_v41 = vsel %vm488_vm4, %v145_v4, %v343_v61  ;;  %v84_v37 = vld [vmem:[#allocation6 + $0x78] sm:$0x1] }
  0xef   :  { %2014 = vmatmul.mubr.msk.f32.vlgmr.msra.gmra.mxu0 %vm603_vm15, %v2520_v31 }
  0xf0   :  { %v2636_v55 = vpop.permute.xlu0 %188  ;;  %v216_v13 = vpop.permute.xlu1 %215  ;;  %710 = vmatprep.mubr.f32.mxu0 %v2153_v21 }
  0xf1   :  { %v196_v49 = vsel %vm194_vm3, %v2636_v55, %v191_v53  ;;  %v220_v7 = vsel %vm219_vm2, %v216_v13, %v2536_v43 }
  0xf2   :  { %v366_v0 = vrot.slane %v196_v49, 6  ;;  %v391_v12 = vrot.slane %v220_v7, 5 }
  0xf3   :  { %2015 = vmatmul.mubr.msk.f32.gmra.mxu0 %vm603_vm15, %v2530_v38 }
  0xf4   :  { %v2644_v58 = vpop.permute.xlu0 %136  ;;  %v2646_v27 = vpop.permute.xlu1 %213  ;;  %716 = vmatprep.mubr.f32.mxu0 %v2153_v21 }
  0xf5   :  { %v146_v5 = vsel %vm144_vm1, %v2644_v58, %v139_v45  ;;  %v221_v2 = vsel %vm219_vm2, %v2646_v27, %v216_v13 }
  0xf6   :  { %v495_v3 = vsel %vm488_vm4, %v146_v5, %v342_v33  ;;  %v390_v59 = vrot.slane %v221_v2, 5 }
  0xf7   :  { %2016 = vmatmul.mubr.msk.f32.gmra.mxu0 %vm603_vm15, %v2542_v46  ;;  %v504_v42 = vsel %vm497_vm6, %v495_v3, %v366_v0 }
  0xf8   :  { %v243_v36 = vpop.permute.xlu0 %242  ;;  %v2657_v18 = vpop.permute.xlu1 %240  ;;  %722 = vmatprep.mubr.f32.mxu0 %v2153_v21  ;;  %v513_v53 = vsel %vm506_vm7, %v504_v42, %v390_v59 }
  0xf9   :  { %v252_v43 = vsel %vm244_vm5, %v243_v36, %v2549_v50  ;;  %v245_v47 = vsel %vm244_vm5, %v2657_v18, %v243_v36  ;;  %v505_v50 = vsel %vm497_vm6, %v496_v41, %v367_v6  ;;  %v522_v63 = vsel %vm515_vm10, %v513_v53, %v406_v52  ;;  %v76_v53 = vld [vmem:[#allocation6 + $0x38] sm:$0xff] }
  0xfa   :  { %v431_v5 = vrot.slane %v252_v43, 3  ;;  %v430_v36 = vrot.slane %v245_v47, 3 }
  0xfb   :  { %2017 = vmatmul.mubr.msk.f32.gmra.mxu0 %vm603_vm15, %v2555_v51 }
  0xfc   :  { %v268_v60 = vpop.permute.xlu0 %267  ;;  %v2678_v34 = vpop.permute.xlu1 %265  ;;  %882 = vmatprep.mubr.f32.mxu0 %v2153_v21 }
  0xfd   :  { %v277_v45 = vsel %vm269_vm8, %v268_v60, %v2580_v62  ;;  %v270_v54 = vsel %vm269_vm8, %v2678_v34, %v268_v60  ;;  %v514_v62 = vsel %vm506_vm7, %v505_v50, %v391_v12  ;;  %v531_v60 = vsel %vm524_vm12, %v522_v63, %v430_v36  ;;  %v83_v12 = vld [vmem:[#allocation6 + $0x70] sm:$0x1] }
  0xfe   :  { %v455_v0 = vrot.slane %v277_v45, 2  ;;  %v454_v2 = vrot.slane %v270_v54, 2  ;;  %v523_v61 = vsel %vm515_vm10, %v514_v62, %v407_v23  ;;  %v75_v23 = vld [vmem:[#allocation6 + $0x30] sm:$0xff] }
  0xff   :  { %v532_v59 = vsel %vm524_vm12, %v523_v61, %v431_v5 }
 0x100   :  { %v293_v13 = vpop.permute.xlu0 %292  ;;  %v2697_v57 = vpop.permute.xlu1 %290  ;;  %v541_v42 = vsel %vm533_vm13, %v532_v59, %v455_v0  ;;  %v540_v41 = vsel %vm533_vm13, %v531_v60, %v454_v2 }
 0x101   :  { %v302_v33 = vsel %vm294_vm9, %v293_v13, %v2595_v29  ;;  %v295_v49 = vsel %vm294_vm9, %v2697_v57, %v293_v13 }
 0x102   :  { %v479_v3 = vrot.slane %v302_v33, 1  ;;  %v478_v4 = vrot.slane %v295_v49, 1 }
 0x104   :  { %v318_v20 = vpop.permute.xlu0 %317  ;;  %v162_v7 = vpop.permute.xlu1 %161  ;;  %v549_v43 = vsel %vm542_vm14, %v540_v41, %v478_v4  ;;  %v550_v45 = vsel %vm542_vm14, %v541_v42, %v479_v3 }
 0x105   :  { %v327_v29 = vsel %vm319_vm11, %v318_v20, %v2621_v10  ;;  %v173_v52 = vsel %vm169_vm0, %v2400_v28, %v162_v7  ;;  %v172_v54 = vsel %vm169_vm0, %v162_v7, %v2623_v14  ;;  %v558_v62 = vmul.f32 %v550_v45, %v76_v53 }
 0x106   :  { %v566_v6 = vmul.f32 %v327_v29, %v84_v37  ;;  %v340_v49 = vrot.slane %v173_v52, 7  ;;  %v341_v5 = vrot.slane %v172_v54, 7  ;;  %v557_v2 = vmul.f32 %v549_v43, %v75_v23 }
 0x107   :  { %v404_v29 = vrot.slane %v2274_v16, 4 }
 0x108   :  { %2030 = vmatprep.subr.msk.mxu1 %vm488_vm4, %v566_v6  ;;  %v316_v47 = vpop.permute.xlu0 %315  ;;  %v187_v10 = vpop.permute.xlu1 %186 }
 0x109   :  { %v320_v13 = vsel %vm319_vm11, %v316_v47, %v318_v20  ;;  %v197_v50 = vsel %vm194_vm3, %v187_v10, %v2636_v55  ;;  %v198_v28 = vsel %vm194_vm3, %v2406_v30, %v187_v10 }
 0x10a   :  { %v565_v33 = vmul.f32 %v320_v13, %v83_v12  ;;  %v364_v36 = vrot.slane %v198_v28, 6  ;;  %v365_v63 = vrot.slane %v197_v50, 6  ;;  %v81_v13 = vld [vmem:[#allocation6 + $0x60] sm:$0x1] }
 0x10c   :  { %2031 = vmatpush1.msk.msra.mxu1 %vm488_vm4, %v565_v33  ;;  %v135_v14 = vpop.permute.xlu0 %134  ;;  %v212_v0 = vpop.permute.xlu1 %211 }
 0x10d   :  { %v147_v55 = vsel %vm144_vm1, %v135_v14, %v2644_v58  ;;  %v148_v30 = vsel %vm144_vm1, %v2412_v32, %v135_v14  ;;  %v222_v37 = vsel %vm219_vm2, %v212_v0, %v2646_v27  ;;  %v223_v3 = vsel %vm219_vm2, %v2416_v35, %v212_v0  ;;  %937 = vmatprep.subr.mxu1 %v558_v62 }
 0x10e   :  { %v493_v4 = vsel %vm488_vm4, %v148_v30, %v340_v49  ;;  %v494_v20 = vsel %vm488_vm4, %v147_v55, %v341_v5  ;;  %v388_v7 = vrot.slane %v223_v3, 5  ;;  %v389_v61 = vrot.slane %v222_v37, 5  ;;  %938 = vmatpush1.msra.mxu1 %v557_v2  ;;  %v2788_v5 = vld [vmem:[#allocation6 + $0x28] sm:$0xff] }
 0x10f   :  { %v502_v58 = vsel %vm497_vm6, %v493_v4, %v364_v36  ;;  %v503_v32 = vsel %vm497_vm6, %v494_v20, %v365_v63  ;;  %v405_v27 = vrot.slane %v2356_v25, 4  ;;  %2032 = vmatmul.mubr.msk.f32.vlgmr.msra.gmra.mxu1 %vm603_vm15, %v2520_v31  ;;  %v2790_v36 = vld [vmem:[#allocation6 + $0x20] sm:$0xff]  ;;  %v590_v4 = vld [vmem:[#allocation3 + $0x98] sm:$0xff] }
 0x110   :  { %v511_v35 = vsel %vm506_vm7, %v502_v58, %v388_v7  ;;  %v512_v59 = vsel %vm506_vm7, %v503_v32, %v389_v61  ;;  %v239_v60 = vpop.permute.xlu0 %238  ;;  %v264_v6 = vpop.permute.xlu1 %263  ;;  %977 = vmatprep.mubr.f32.mxu1 %v2153_v21  ;;  %v589_v7 = vld [vmem:[#allocation3 + $0x90] sm:$0xff]  ;;  %v582_v61 = vld [vmem:[#allocation3 + $0x58] sm:$0xff] }
 0x111   :  { %v246_v42 = vsel %vm244_vm5, %v239_v60, %v2657_v18  ;;  %v247_v16 = vsel %vm244_vm5, %v2422_v39, %v239_v60  ;;  %v271_v12 = vsel %vm269_vm8, %v264_v6, %v2678_v34  ;;  %v272_v43 = vsel %vm269_vm8, %v2435_v44, %v264_v6  ;;  %v82_v34 = vld [vmem:[#allocation6 + $0x68] sm:$0x1]  ;;  %v598_v32 = vld [vmem:[#allocation3 + $0xd8] sm:$0xff]  ;;  %v573_v60 = vld [vmem:[#allocation3 + $0x10] sm:$0xff] }
 0x112   :  { %v428_v25 = vrot.slane %v247_v16, 3  ;;  %v429_v41 = vrot.slane %v246_v42, 3  ;;  %v520_v52 = vsel %vm515_vm10, %v511_v35, %v404_v29  ;;  %v521_v10 = vsel %vm515_vm10, %v512_v59, %v405_v27  ;;  %v574_v35 = vld [vmem:[#allocation3 + $0x18] sm:$0xff] }
 0x113   :  { %v452_v53 = vrot.slane %v272_v43, 2  ;;  %v453_v18 = vrot.slane %v271_v12, 2  ;;  %2033 = vmatmul.mubr.msk.f32.gmra.mxu1 %vm603_vm15, %v2530_v38 }
 0x114   :  { %v529_v39 = vsel %vm524_vm12, %v520_v52, %v428_v25  ;;  %v530_v45 = vsel %vm524_vm12, %v521_v10, %v429_v41  ;;  %v289_v54 = vpop.permute.xlu0 %288  ;;  %v314_v50 = vpop.permute.xlu1 %313  ;;  %983 = vmatprep.mubr.f32.mxu1 %v2153_v21 }
 0x115   :  { %v296_v44 = vsel %vm294_vm9, %v289_v54, %v2697_v57  ;;  %v297_v28 = vsel %vm294_vm9, %v2462_v56, %v289_v54  ;;  %v321_v49 = vsel %vm319_vm11, %v314_v50, %v316_v47  ;;  %v322_v62 = vsel %vm319_vm11, %v2495_v48, %v314_v50  ;;  %v2821_v54 = vld [vmem:[%s3498_s7] sm:$0xff] }
 0x116   :  { %v476_v23 = vrot.slane %v297_v28, 1  ;;  %v477_v33 = vrot.slane %v296_v44, 1  ;;  %v538_v63 = vsel %vm533_vm13, %v529_v39, %v452_v53  ;;  %v539_v57 = vsel %vm533_vm13, %v530_v45, %v453_v18 }
 0x117   :  { %v563_v14 = vmul.f32 %v322_v62, %v81_v13  ;;  %v564_v0 = vmul.f32 %v321_v49, %v82_v34  ;;  %2034 = vmatmul.mubr.msk.f32.gmra.mxu1 %vm603_vm15, %v2542_v46  ;;  %v2829_v13 = vld [vmem:[%s3498_s7 + $0x8] sm:$0x1]  ;;  %v595_v49 = vld [vmem:[#allocation3 + $0xc0] sm:$0xff] }
 0x118   :  { %v547_v56 = vsel %vm542_vm14, %v538_v63, %v476_v23  ;;  %v548_v47 = vsel %vm542_vm14, %v539_v57, %v477_v33  ;;  %989 = vmatprep.mubr.f32.mxu1 %v2153_v21  ;;  %v588_v62 = vld [vmem:[#allocation3 + $0x88] sm:$0xff] }
 0x119   :  { %2024 = vmatprep.subr.msk.mxu0 %vm488_vm4, %v564_v0  ;;  %v556_v48 = vmul.f32 %v548_v47, %v2788_v5  ;;  %v555_v2 = vmul.f32 %v547_v56, %v2790_v36  ;;  %v596_v57 = vld [vmem:[#allocation3 + $0xc8] sm:$0xff] }
 0x11a   :  { %2025 = vmatpush1.msk.msra.mxu0 %vm488_vm4, %v563_v14  ;;  %vm1030_vm4 = vcmask 261120   ;;  %v587_v14 = vld [vmem:[#allocation3 + $0x80] sm:$0xff]  ;;  %v580_v0 = vld [vmem:[#allocation3 + $0x48] sm:$0xff] }
 0x11b   :  { %848 = vmatprep.subr.mxu0 %v556_v48  ;;  %2035 = vmatmul.mubr.msk.f32.gmra.mxu1 %vm603_vm15, %v2555_v51  ;;  %v579_v48 = vld [vmem:[#allocation3 + $0x40] sm:$0xff] }
 0x11c   :  { %849 = vmatpush1.msra.mxu0 %v555_v2  ;;  %1178 = vmatprep.mubr.f32.mxu1 %v2153_v21 }
 0x11d   :  { %2026 = vmatmul.mubr.msk.f32.vlgmr.msra.gmra.mxu0 %vm603_vm15, %v2520_v31 }
 0x11e   :  { %888 = vmatprep.mubr.f32.mxu0 %v2153_v21 }
 0x121   :  { %2027 = vmatmul.mubr.msk.f32.gmra.mxu0 %vm603_vm15, %v2530_v38  ;;  %v597_v38 = vld [vmem:[#allocation3 + $0xd0] sm:$0xff] }
 0x122   :  { %894 = vmatprep.mubr.f32.mxu0 %v2153_v21 }
 0x125   :  { %2028 = vmatmul.mubr.msk.f32.gmra.mxu0 %vm603_vm15, %v2542_v46  ;;  %v581_v46 = vld [vmem:[#allocation3 + $0x50] sm:$0xff] }
 0x126   :  { %900 = vmatprep.mubr.f32.mxu0 %v2153_v21 }
 0x129   :  { %2029 = vmatmul.mubr.msk.f32.gmra.mxu0 %vm603_vm15, %v2555_v51 }
 0x12a   :  { %1101 = vmatprep.mubr.f32.mxu0 %v2153_v21 }
 0x18f   :  { %v795_v55 = vpop.f32.mrf.mxu1 }
 0x190   :  { %v796_v52 = vadd.f32 %v795_v55, %v573_v60 }
 0x191   :  { %v797_v30 = vpop.f32.mrf.mxu1 }
 0x192   :  { %v798_v41 = vadd.f32 %v797_v30, %v574_v35  ;;  %v998_v45 = vmax.f32 %v796_v52, 0.0  ;;  %v572_v30 = vld [vmem:[#allocation3 + $0x8] sm:$0xff] }
 0x193   :  { %v801_v31 = vpop.f32.mrf.mxu1 }
 0x194   :  { %v802_v16 = vadd.f32 %v801_v31, %v581_v46  ;;  %v999_v39 = vmax.f32 %v798_v41, 0.0  ;;  %v601_v41 = vld [vmem:[#allocation3 + $0xf0] sm:$0xff] }
 0x195   :  { %v803_v37 = vpop.f32.mrf.mxu1 }
 0x196   :  { %v804_v6 = vadd.f32 %v803_v37, %v582_v61  ;;  %v1006_v18 = vmax.f32 %v802_v16, 0.0  ;;  %v571_v37 = vld [vmem:[#allocation3] sm:$0xff]  ;;  %v594_v16 = vld [vmem:[#allocation3 + $0xb8] sm:$0xff] }
 0x197   :  { %v807_v3 = vpop.f32.mrf.mxu1 }
 0x198   :  { %v808_v59 = vadd.f32 %v807_v3, %v589_v7  ;;  %v1007_v53 = vmax.f32 %v804_v6, 0.0 }
 0x199   :  { %v809_v20 = vpop.f32.mrf.mxu1 }
 0x19a   :  { %v810_v29 = vadd.f32 %v809_v20, %v590_v4  ;;  %v1014_v10 = vmax.f32 %v808_v59, 0.0 }
 0x19b   :  { %v813_v58 = vpop.f32.mrf.mxu1 }
 0x19c   :  { %v814_v27 = vadd.f32 %v813_v58, %v597_v38  ;;  %v1015_v12 = vmax.f32 %v810_v29, 0.0 }
 0x19d   :  { %v815_v51 = vpop.f32.mrf.mxu1 }
 0x19e   :  { %v816_v42 = vadd.f32 %v815_v51, %v598_v32  ;;  %v1022_v25 = vmax.f32 %v814_v27, 0.0 }
 0x1a0   :  { %v1023_v43 = vmax.f32 %v816_v42, 0.0 }
 0x1a2   :  { %1138 = vmatprep.subr.mxu1 %v1023_v43  ;;  %v586_v43 = vld [vmem:[#allocation3 + $0x78] sm:$0xff] }
 0x1a3   :  { %1139 = vmatpush1.msra.mxu1 %v1022_v25 }
 0x1a4   :  { %1140 = vmatprep.subr.mxu1 %v1015_v12  ;;  %v593_v12 = vld [vmem:[#allocation3 + $0xb0] sm:$0xff] }
 0x1a5   :  { %1141 = vmatpush1.msra.mxu1 %v1014_v10  ;;  %v602_v10 = vld [vmem:[#allocation3 + $0xf8] sm:$0xff] }
 0x1a6   :  { %1142 = vmatprep.subr.mxu1 %v1007_v53  ;;  %v585_v53 = vld [vmem:[#allocation3 + $0x70] sm:$0xff] }
 0x1a7   :  { %1143 = vmatpush1.msra.mxu1 %v1006_v18 }
 0x1a8   :  { %1144 = vmatprep.subr.mxu1 %v999_v39 }
 0x1a9   :  { %1145 = vmatpush1.msra.mxu1 %v998_v45 }
 0x1aa   :  { %2038 = vmatmul.mubr.msk.f32.vlgmr.msra.gmra.mxu1 %vm1030_vm4, %v2821_v54 }
 0x1ab   :  { %1184 = vmatprep.mubr.f32.mxu1 %v2153_v21 }
 0x1ae   :  { %2039 = vmatmul.mubr.msk.f32.gmra.mxu1 %vm1030_vm4, %v2829_v13 }
 0x1af   :  { %v706_v34 = vpop.f32.mrf.mxu0  ;;  %1332 = vmatprep.mubr.f32.mxu1 %v2153_v21 }
 0x1b0   :  { %v707_v58 = vadd.f32 %v706_v34, %v571_v37  ;;  %v578_v34 = vld [vmem:[#allocation3 + $0x38] sm:$0xff] }
 0x1b1   :  { %v708_v50 = vpop.f32.mrf.mxu0 }
 0x1b2   :  { %v709_v7 = vadd.f32 %v708_v50, %v572_v30  ;;  %v996_v35 = vmax.f32 %v707_v58, 0.0 }
 0x1b3   :  { %v712_v44 = vpop.f32.mrf.mxu0 }
 0x1b4   :  { %v713_v20 = vadd.f32 %v712_v44, %v579_v48  ;;  %v997_v27 = vmax.f32 %v709_v7, 0.0  ;;  %v591_v7 = vld [vmem:[#allocation3 + $0xa0] sm:$0xff] }
 0x1b5   :  { %v714_v28 = vpop.f32.mrf.mxu0 }
 0x1b6   :  { %v715_v3 = vadd.f32 %v714_v28, %v580_v0  ;;  %v1004_v29 = vmax.f32 %v713_v20, 0.0  ;;  %v577_v28 = vld [vmem:[#allocation3 + $0x30] sm:$0xff] }
 0x1b7   :  { %v718_v23 = vpop.f32.mrf.mxu0 }
 0x1b8   :  { %v719_v31 = vadd.f32 %v718_v23, %v587_v14  ;;  %v1005_v46 = vmax.f32 %v715_v3, 0.0 }
 0x1b9   :  { %v720_v33 = vpop.f32.mrf.mxu0 }
 0x1ba   :  { %v721_v2 = vadd.f32 %v720_v33, %v588_v62  ;;  %v1012_v32 = vmax.f32 %v719_v31, 0.0 }
 0x1bb   :  { %v724_v63 = vpop.f32.mrf.mxu0 }
 0x1bc   :  { %v725_v56 = vadd.f32 %v724_v63, %v595_v49  ;;  %v1013_v61 = vmax.f32 %v721_v2, 0.0 }
 0x1bd   :  { %v726_v47 = vpop.f32.mrf.mxu0 }
 0x1be   :  { %v727_v55 = vadd.f32 %v726_v47, %v596_v57  ;;  %v1020_v38 = vmax.f32 %v725_v56, 0.0 }
 0x1c0   :  { %v1021_v4 = vmax.f32 %v727_v55, 0.0 }
 0x1c2   :  { %1061 = vmatprep.subr.mxu0 %v1021_v4  ;;  %v592_v4 = vld [vmem:[#allocation3 + $0xa8] sm:$0xff] }
 0x1c3   :  { %1062 = vmatpush1.msra.mxu0 %v1020_v38  ;;  %v599_v38 = vld [vmem:[#allocation3 + $0xe0] sm:$0xff] }
 0x1c4   :  { %1063 = vmatprep.subr.mxu0 %v1013_v61  ;;  %v584_v61 = vld [vmem:[#allocation3 + $0x68] sm:$0xff] }
 0x1c5   :  { %1064 = vmatpush1.msra.mxu0 %v1012_v32  ;;  %v600_v32 = vld [vmem:[#allocation3 + $0xe8] sm:$0xff] }
 0x1c6   :  { %1065 = vmatprep.subr.mxu0 %v1005_v46  ;;  %v583_v46 = vld [vmem:[#allocation3 + $0x60] sm:$0xff] }
 0x1c7   :  { %1066 = vmatpush1.msra.mxu0 %v1004_v29 }
 0x1c8   :  { %1067 = vmatprep.subr.mxu0 %v997_v27 }
 0x1c9   :  { %1068 = vmatpush1.msra.mxu0 %v996_v35 }
 0x1ca   :  { %2036 = vmatmul.mubr.msk.f32.vlgmr.msra.gmra.mxu0 %vm1030_vm4, %v2821_v54 }
 0x1cb   :  { %1107 = vmatprep.mubr.f32.mxu0 %v2153_v21 }
 0x1ce   :  { %2037 = vmatmul.mubr.msk.f32.gmra.mxu0 %vm1030_vm4, %v2829_v13 }
 0x1cf   :  { %v973_v59 = vpop.f32.mrf.mxu1  ;;  %1255 = vmatprep.mubr.f32.mxu0 %v2153_v21 }
 0x1d0   :  { %v974_v47 = vadd.f32 %v973_v59, %v577_v28 }
 0x1d1   :  { %v975_v51 = vpop.f32.mrf.mxu1 }
 0x1d2   :  { %v976_v57 = vadd.f32 %v975_v51, %v578_v34  ;;  %v1002_v37 = vmax.f32 %v974_v47, 0.0 }
 0x1d3   :  { %v979_v60 = vpop.f32.mrf.mxu1 }
 0x1d4   :  { %v980_v62 = vadd.f32 %v979_v60, %v585_v53  ;;  %v1003_v31 = vmax.f32 %v976_v57, 0.0 }
 0x1d5   :  { %v981_v6 = vpop.f32.mrf.mxu1 }
 0x1d6   :  { %v982_v23 = vadd.f32 %v981_v6, %v586_v43  ;;  %v1010_v30 = vmax.f32 %v980_v62, 0.0  ;;  %v576_v6 = vld [vmem:[#allocation3 + $0x28] sm:$0xff] }
 0x1d7   :  { %v985_v42 = vpop.f32.mrf.mxu1 }
 0x1d8   :  { %v986_v50 = vadd.f32 %v985_v42, %v593_v12  ;;  %v1011_v2 = vmax.f32 %v982_v23, 0.0 }
 0x1d9   :  { %v987_v25 = vpop.f32.mrf.mxu1 }
 0x1da   :  { %v988_v18 = vadd.f32 %v987_v25, %v594_v16  ;;  %v1018_v48 = vmax.f32 %v986_v50, 0.0  ;;  %v575_v25 = vld [vmem:[#allocation3 + $0x20] sm:$0xff] }
 0x1db   :  { %v991_v52 = vpop.f32.mrf.mxu1 }
 0x1dc   :  { %v992_v39 = vadd.f32 %v991_v52, %v601_v41  ;;  %v1019_v14 = vmax.f32 %v988_v18, 0.0 }
 0x1dd   :  { %v884_v45 = vpop.f32.mrf.mxu0  ;;  %v993_v44 = vpop.f32.mrf.mxu1 }
 0x1de   :  { %v994_v33 = vadd.f32 %v993_v44, %v602_v10  ;;  %v1026_v63 = vmax.f32 %v992_v39, 0.0  ;;  %v885_v53 = vadd.f32 %v884_v45, %v575_v25 }
 0x1df   :  { %v886_v49 = vpop.f32.mrf.mxu0 }
 0x1e0   :  { %v1027_v0 = vmax.f32 %v994_v33, 0.0  ;;  %v887_v52 = vadd.f32 %v886_v49, %v576_v6  ;;  %v1000_v34 = vmax.f32 %v885_v53, 0.0 }
 0x1e1   :  { %v890_v56 = vpop.f32.mrf.mxu0 }
 0x1e2   :  { %1292 = vmatprep.subr.mxu1 %v1027_v0  ;;  %v891_v42 = vadd.f32 %v890_v56, %v583_v46  ;;  %v1001_v39 = vmax.f32 %v887_v52, 0.0 }
 0x1e3   :  { %v892_v55 = vpop.f32.mrf.mxu0  ;;  %1293 = vmatpush1.msra.mxu1 %v1026_v63 }
 0x1e4   :  { %1294 = vmatprep.subr.mxu1 %v1019_v14  ;;  %v893_v51 = vadd.f32 %v892_v55, %v584_v61  ;;  %v1008_v18 = vmax.f32 %v891_v42, 0.0 }
 0x1e5   :  { %v896_v3 = vpop.f32.mrf.mxu0  ;;  %1295 = vmatpush1.msra.mxu1 %v1018_v48 }
 0x1e6   :  { %1296 = vmatprep.subr.mxu1 %v1011_v2  ;;  %v897_v35 = vadd.f32 %v896_v3, %v591_v7  ;;  %v1009_v10 = vmax.f32 %v893_v51, 0.0 }
 0x1e7   :  { %v898_v20 = vpop.f32.mrf.mxu0  ;;  %1297 = vmatpush1.msra.mxu1 %v1010_v30 }
 0x1e8   :  { %1298 = vmatprep.subr.mxu1 %v1003_v31  ;;  %v899_v29 = vadd.f32 %v898_v20, %v592_v4  ;;  %v1016_v43 = vmax.f32 %v897_v35, 0.0 }
 0x1e9   :  { %v902_v58 = vpop.f32.mrf.mxu0  ;;  %1299 = vmatpush1.msra.mxu1 %v1002_v37 }
 0x1ea   :  { %v903_v27 = vadd.f32 %v902_v58, %v599_v38  ;;  %2042 = vmatmul.mubr.msk.f32.vlgmr.msra.gmra.mxu1 %vm1030_vm4, %v2821_v54  ;;  %v1017_v41 = vmax.f32 %v899_v29, 0.0 }
 0x1eb   :  { %v904_v59 = vpop.f32.mrf.mxu0  ;;  %1338 = vmatprep.mubr.f32.mxu1 %v2153_v21 }
 0x1ec   :  { %v905_v60 = vadd.f32 %v904_v59, %v600_v32  ;;  %v1024_v16 = vmax.f32 %v903_v27, 0.0 }
 0x1ee   :  { %v1025_v12 = vmax.f32 %v905_v60, 0.0  ;;  %2043 = vmatmul.mubr.msk.f32.gmra.mxu1 %vm1030_vm4, %v2829_v13 }
 0x1f0   :  { %1215 = vmatprep.subr.mxu0 %v1025_v12 }
 0x1f1   :  { %1216 = vmatpush1.msra.mxu0 %v1024_v16 }
 0x1f2   :  { %1217 = vmatprep.subr.mxu0 %v1017_v41 }
 0x1f3   :  { %1218 = vmatpush1.msra.mxu0 %v1016_v43 }
 0x1f4   :  { %1219 = vmatprep.subr.mxu0 %v1009_v10 }
 0x1f5   :  { %1220 = vmatpush1.msra.mxu0 %v1008_v18 }
 0x1f6   :  { %1221 = vmatprep.subr.mxu0 %v1001_v39 }
 0x1f7   :  { %1222 = vmatpush1.msra.mxu0 %v1000_v34 }
 0x1f8   :  { %2040 = vmatmul.mubr.msk.f32.vlgmr.msra.gmra.mxu0 %vm1030_vm4, %v2821_v54 }
 0x1f9   :  { %1261 = vmatprep.mubr.f32.mxu0 %v2153_v21 }
 0x1fc   :  { %2041 = vmatmul.mubr.msk.f32.gmra.mxu0 %vm1030_vm4, %v2829_v13 }
 0x26a   :  { %v2856_v44 = vpop.f32.mrf.mxu1 }
 0x26b   :  { %v1475_v13 = vrot.slane %v2856_v44, 2  ;;  %v1395_v28 = vrot.slane %v2856_v44, 1  ;;  %v1667_v49 = vrot.slane %v2856_v44, 5  ;;  %v1547_v57 = vrot.slane %v2856_v44, 3 }
 0x26c   :  { %v2862_v54 = vpop.f32.mrf.mxu1  ;;  %v1739_v14 = vrot.slane %v2856_v44, 6  ;;  %v1811_v47 = vrot.slane %v2856_v44, 7 }
 0x26d   :  { %v1396_v48 = vrot.slane %v2862_v54, 1  ;;  %v1548_v2 = vrot.slane %v2862_v54, 3  ;;  %v1668_v37 = vrot.slane %v2862_v54, 5  ;;  %v1476_v3 = vrot.slane %v2862_v54, 2 }
 0x26e   :  { %v1740_v20 = vrot.slane %v2862_v54, 6  ;;  %v1812_v38 = vrot.slane %v2862_v54, 7  ;;  %v1186_v32 = vpop.f32.mrf.mxu1 }
 0x270   :  { %v1188_v29 = vpop.f32.mrf.mxu1 }
 0x28a   :  { %v2850_v50 = vpop.f32.mrf.mxu0 }
 0x28b   :  { %1345 = vrot.lane.b32.xlu0 %v2850_v50, %s2147_s3  ;;  %v1393_v21 = vrot.slane %v2850_v50, 1  ;;  %v1665_v23 = vrot.slane %v2850_v50, 5  ;;  %v1473_v33 = vrot.slane %v2850_v50, 2  ;;  %v1545_v62 = vrot.slane %v2850_v50, 3 }
 0x28c   :  { %v2854_v45 = vpop.f32.mrf.mxu0  ;;  %v1737_v63 = vrot.slane %v2850_v50, 6  ;;  %v1809_v0 = vrot.slane %v2850_v50, 7 }
 0x28d   :  { %1347 = vrot.lane.b32.xlu1 %v2854_v45, %s2147_s3  ;;  %v1394_v56 = vrot.slane %v2854_v45, 1  ;;  %v1474_v55 = vrot.slane %v2854_v45, 2  ;;  %v1666_v30 = vrot.slane %v2854_v45, 5  ;;  %v1546_v31 = vrot.slane %v2854_v45, 3 }
 0x28e   :  { %v1738_v4 = vrot.slane %v2854_v45, 6  ;;  %v1109_v7 = vpop.f32.mrf.mxu0  ;;  %v1810_v61 = vrot.slane %v2854_v45, 7 }
 0x28f   :  { %1349 = vrot.lane.b32.xlu0 %v2856_v44, %s2147_s3 }
 0x290   :  { %v1111_v58 = vpop.f32.mrf.mxu0 }
 0x291   :  { %1351 = vrot.lane.b32.xlu1 %v2862_v54, %s2147_s3 }
 0x293   :  { %1409 = vrot.lane.b32.xlu0 %v1393_v21, %s2145_s0 }
 0x295   :  { %1493 = vrot.lane.b32.xlu1 %v1475_v13, %s2146_s2 }
 0x297   :  { %1413 = vrot.lane.b32.xlu0 %v1395_v28, %s2145_s0 }
 0x299   :  { %1681 = vrot.lane.b32.xlu1 %v1665_v23, %s2149_s28 }
 0x29b   :  { %1489 = vrot.lane.b32.xlu0 %v1473_v33, %s2146_s2 }
 0x29d   :  { %1685 = vrot.lane.b32.xlu1 %v1667_v49, %s2149_s28 }
 0x29f   :  { %1561 = vrot.lane.b32.xlu0 %v1545_v62, %s2148_s27 }
 0x2a1   :  { %1753 = vrot.lane.b32.xlu1 %v1737_v63, %s2150_s29 }
 0x2a3   :  { %1565 = vrot.lane.b32.xlu0 %v1547_v57, %s2148_s27 }
 0x2a5   :  { %1757 = vrot.lane.b32.xlu1 %v1739_v14, %s2150_s29 }
 0x2a7   :  { %1825 = vrot.lane.b32.xlu0 %v1809_v0, %s2151_s30 }
 0x2a9   :  { %1411 = vrot.lane.b32.xlu1 %v1394_v56, %s2145_s0 }
 0x2aa   :  { %v2921_v27 = vpop.f32.mrf.mxu1 }
 0x2ab   :  { %1829 = vrot.lane.b32.xlu0 %v1811_v47, %s2151_s30  ;;  %v1399_v51 = vrot.slane %v2921_v27, 1  ;;  %v1479_v6 = vrot.slane %v2921_v27, 2  ;;  %v1671_v41 = vrot.slane %v2921_v27, 5  ;;  %v1551_v12 = vrot.slane %v2921_v27, 3 }
 0x2ac   :  { %v2934_v60 = vpop.f32.mrf.mxu1  ;;  %v1743_v53 = vrot.slane %v2921_v27, 6  ;;  %v1815_v28 = vrot.slane %v2921_v27, 7 }
 0x2ad   :  { %1415 = vrot.lane.b32.xlu1 %v1396_v48, %s2145_s0  ;;  %v1480_v10 = vrot.slane %v2934_v60, 2  ;;  %v1552_v18 = vrot.slane %v2934_v60, 3  ;;  %v1400_v21 = vrot.slane %v2934_v60, 1  ;;  %v1672_v23 = vrot.slane %v2934_v60, 5 }
 0x2ae   :  { %v1744_v57 = vrot.slane %v2934_v60, 6 }
 0x2af   :  { %1567 = vrot.lane.b32.xlu0 %v1548_v2, %s2148_s27 }
 0x2b1   :  { %1491 = vrot.lane.b32.xlu1 %v1474_v55, %s2146_s2  ;;  %v1816_v55 = vrot.slane %v2934_v60, 7 }
 0x2b3   :  { %1683 = vrot.lane.b32.xlu0 %v1666_v30, %s2149_s28 }
 0x2b5   :  { %1563 = vrot.lane.b32.xlu1 %v1546_v31, %s2148_s27  ;;  %v1340_v31 = vpop.f32.mrf.mxu1 }
 0x2b7   :  { %1687 = vrot.lane.b32.xlu0 %v1668_v37, %s2149_s28 }
 0x2b8   :  { %v2916_v46 = vpop.f32.mrf.mxu0 }
 0x2b9   :  { %1495 = vrot.lane.b32.xlu1 %v1476_v3, %s2146_s2  ;;  %v1397_v35 = vrot.slane %v2916_v46, 1  ;;  %v1477_v42 = vrot.slane %v2916_v46, 2  ;;  %v1669_v16 = vrot.slane %v2916_v46, 5  ;;  %v1549_v25 = vrot.slane %v2916_v46, 3 }
 0x2ba   :  { %v2928_v59 = vpop.f32.mrf.mxu0  ;;  %v1813_v43 = vrot.slane %v2916_v46, 7  ;;  %v1741_v52 = vrot.slane %v2916_v46, 6 }
 0x2bb   :  { %1755 = vrot.lane.b32.xlu0 %v1738_v4, %s2150_s29  ;;  %v1398_v39 = vrot.slane %v2928_v59, 1  ;;  %v1478_v34 = vrot.slane %v2928_v59, 2  ;;  %v1670_v13 = vrot.slane %v2928_v59, 5  ;;  %v1550_v33 = vrot.slane %v2928_v59, 3  ;;  %v1342_v4 = vpop.f32.mrf.mxu1 }
 0x2bc   :  { %v1814_v49 = vrot.slane %v2928_v59, 7  ;;  %v1742_v62 = vrot.slane %v2928_v59, 6  ;;  %v1263_v14 = vpop.f32.mrf.mxu0 }
 0x2bd   :  { %1759 = vrot.lane.b32.xlu1 %v1740_v20, %s2150_s29 }
 0x2be   :  { %v1265_v48 = vpop.f32.mrf.mxu0 }
 0x2bf   :  { %1831 = vrot.lane.b32.xlu0 %v1812_v38, %s2151_s30 }
 0x2c1   :  { %1827 = vrot.lane.b32.xlu1 %v1810_v61, %s2151_s30 }
 0x2c3   :  { %1883 = vrot.lane.b32.xlu0 %v1111_v58, %s2152_s10 }
 0x2c5   :  { %1881 = vrot.lane.b32.xlu1 %v1109_v7, %s2152_s10 }
 0x2c7   :  { %1353 = vrot.lane.b32.xlu0 %v2916_v46, %s2147_s3 }
 0x2c9   :  { %1885 = vrot.lane.b32.xlu1 %v1186_v32, %s2152_s10 }
 0x2cb   :  { %1357 = vrot.lane.b32.xlu0 %v2921_v27, %s2147_s3 }
 0x2cd   :  { %1887 = vrot.lane.b32.xlu1 %v1188_v29, %s2152_s10 }
 0x2cf   :  { %1417 = vrot.lane.b32.xlu0 %v1397_v35, %s2145_s0 }
 0x2d1   :  { %1355 = vrot.lane.b32.xlu1 %v2928_v59, %s2147_s3 }
 0x2d3   :  { %1421 = vrot.lane.b32.xlu0 %v1399_v51, %s2145_s0 }
 0x2d5   :  { %1359 = vrot.lane.b32.xlu1 %v2934_v60, %s2147_s3 }
 0x2d7   :  { %1501 = vrot.lane.b32.xlu0 %v1479_v6, %s2146_s2  ;;  %v1442_v6 = vrot.slane %v2625_v26, 1 }
 0x2d9   :  { %1497 = vrot.lane.b32.xlu1 %v1477_v42, %s2146_s2  ;;  %v3012_v42 = vld [vmem:[#allocation6 + $0x10] sm:$0xff] }
 0x2db   :  { %1689 = vrot.lane.b32.xlu0 %v1669_v16, %s2149_s28  ;;  %v1443_v16 = vrot.slane %v3012_v42, 1 }
 0x2dd   :  { %1569 = vrot.lane.b32.xlu1 %v1549_v25, %s2148_s27 }
 0x2df   :  { %1693 = vrot.lane.b32.xlu0 %v1671_v41, %s2149_s28 }
 0x2e1   :  { %1573 = vrot.lane.b32.xlu1 %v1551_v12, %s2148_s27 }
 0x2e3   :  { %1833 = vrot.lane.b32.xlu0 %v1813_v43, %s2151_s30 }
 0x2e5   :  { %1761 = vrot.lane.b32.xlu1 %v1741_v52, %s2150_s29  ;;  %v3023_v52 = vld [vmem:[#allocation6 + $0x18] sm:$0xff] }
 0x2e7   :  { %1503 = vrot.lane.b32.xlu0 %v1480_v10, %s2146_s2  ;;  %v1444_v10 = vrot.slane %v3023_v52, 1 }
 0x2e9   :  { %1765 = vrot.lane.b32.xlu1 %v1743_v53, %s2150_s29 }
 0x2eb   :  { %1575 = vrot.lane.b32.xlu0 %v1552_v18, %s2148_s27 }
 0x2ed   :  { %1419 = vrot.lane.b32.xlu1 %v1398_v39, %s2145_s0 }
 0x2ef   :  { %1499 = vrot.lane.b32.xlu0 %v1478_v34, %s2146_s2 }
 0x2f1   :  { %1423 = vrot.lane.b32.xlu1 %v1400_v21, %s2145_s0 }
 0x2f3   :  { %1691 = vrot.lane.b32.xlu0 %v1670_v13, %s2149_s28 }
 0x2f5   :  { %1837 = vrot.lane.b32.xlu1 %v1815_v28, %s2151_s30 }
 0x2f7   :  { %1695 = vrot.lane.b32.xlu0 %v1672_v23, %s2149_s28 }
 0x2f9   :  { %1571 = vrot.lane.b32.xlu1 %v1550_v33, %s2148_s27 }
 0x2fb   :  { %1835 = vrot.lane.b32.xlu0 %v1814_v49, %s2151_s30 }
 0x2fd   :  { %v2977_v63 = vpop.permute.xlu0 %1345  ;;  %1763 = vrot.lane.b32.xlu1 %v1742_v62, %s2150_s29 }
 0x2ff   :  { %v1348_v0 = vpop.permute.xlu1 %1347  ;;  %1767 = vrot.lane.b32.xlu0 %v1744_v57, %s2150_s29 }
 0x300   :  { %v1367_v25 = vsel %vm144_vm1, %v2977_v63, %v1348_v0 }
 0x301   :  { %v1350_v56 = vpop.permute.xlu0 %1349  ;;  %1889 = vrot.lane.b32.xlu1 %v1263_v14, %s2152_s10  ;;  %v1370_v53 = vmul.f32 %v1367_v25, %v2625_v26  ;;  %v1514_v14 = vrot.slane %v2625_v26, 2  ;;  %v2060_v26 = vld [vmem:[#allocation6 + $0x8] sm:$0xff] }
 0x302   :  { %v1366_v47 = vsel %vm144_vm1, %v1348_v0, %v1350_v56  ;;  %v1515_v0 = vrot.slane %v3012_v42, 2 }
 0x303   :  { %v2985_v2 = vpop.permute.xlu1 %1351  ;;  %1891 = vrot.lane.b32.xlu0 %v1265_v48, %s2152_s10  ;;  %v1371_v18 = vmul.f32 %v3012_v42, %v1366_v47 }
 0x304   :  { %v1365_v30 = vsel %vm144_vm1, %v1350_v56, %v2985_v2 }
 0x305   :  { %v2992_v37 = vpop.permute.xlu0 %1409  ;;  %1839 = vrot.lane.b32.xlu1 %v1816_v55, %s2151_s30  ;;  %v1372_v49 = vmul.f32 %v3023_v52, %v1365_v30 }
 0x307   :  { %v2995_v3 = vpop.permute.xlu1 %1493  ;;  %1893 = vrot.lane.b32.xlu0 %v1340_v31, %s2152_s10 }
 0x309   :  { %v1414_v20 = vpop.permute.xlu0 %1413  ;;  %1895 = vrot.lane.b32.xlu1 %v1342_v4, %s2152_s10 }
 0x30b   :  { %v2999_v38 = vpop.permute.xlu1 %1681 }
 0x30d   :  { %v3001_v7 = vpop.permute.xlu0 %1489 }
 0x30f   :  { %v1686_v61 = vpop.permute.xlu1 %1685 }
 0x311   :  { %v3003_v58 = vpop.permute.xlu0 %1561 }
 0x313   :  { %v3005_v32 = vpop.permute.xlu1 %1753 }
 0x315   :  { %v1566_v29 = vpop.permute.xlu0 %1565 }
 0x317   :  { %v3007_v35 = vpop.permute.xlu1 %1757 }
 0x319   :  { %v3009_v51 = vpop.permute.xlu0 %1825 }
 0x31b   :  { %v1412_v41 = vpop.permute.xlu1 %1411 }
 0x31c   :  { %v1430_v12 = vsel %vm169_vm0, %v1412_v41, %v1414_v20  ;;  %v1431_v43 = vsel %vm169_vm0, %v2992_v37, %v1412_v41  ;;  %v1619_v41 = vrot.slane %v2856_v44, 4  ;;  %v1707_v44 = vrot.slane %v3012_v42, 5 }
 0x31d   :  { %v1458_v39 = vmul.f32 %v1442_v6, %v1431_v43  ;;  %v1459_v34 = vmul.f32 %v1443_v16, %v1430_v12  ;;  %v3028_v21 = vpop.permute.xlu0 %1829  ;;  %v1586_v6 = vrot.slane %v2060_v26, 3  ;;  %v1587_v16 = vrot.slane %v3012_v42, 3 }
 0x31e   :  { %v1635_v12 = vrot.slane %v3012_v42, 4 }
 0x31f   :  { %v1466_v13 = vadd.f32 %v1458_v39, %v1370_v53  ;;  %v1467_v28 = vadd.f32 %v1459_v34, %v1371_v18  ;;  %v3030_v23 = vpop.permute.xlu1 %1415  ;;  %v1618_v53 = vrot.slane %v2854_v45, 4  ;;  %v1634_v18 = vrot.slane %v2060_v26, 4 }
 0x320   :  { %v1429_v33 = vsel %vm169_vm0, %v1414_v20, %v3030_v23  ;;  %v1706_v34 = vrot.slane %v2060_v26, 5 }
 0x321   :  { %v1460_v62 = vmul.f32 %v1444_v10, %v1429_v33  ;;  %v3036_v57 = vpop.permute.xlu0 %1567 }
 0x322   :  { %v1581_v56 = vsel %vm219_vm2, %v1566_v29, %v3036_v57 }
 0x323   :  { %v1468_v47 = vadd.f32 %v1460_v62, %v1372_v49  ;;  %v1492_v48 = vpop.permute.xlu1 %1491 }
 0x324   :  { %v1510_v55 = vsel %vm194_vm3, %v1492_v48, %v2995_v3  ;;  %v1511_v30 = vsel %vm194_vm3, %v3001_v7, %v1492_v48  ;;  %v1620_v48 = vrot.slane %v2862_v54, 4 }
 0x325   :  { %v1530_v31 = vmul.f32 %v1514_v14, %v1511_v30  ;;  %v1531_v4 = vmul.f32 %v1515_v0, %v1510_v55  ;;  %v3049_v20 = vpop.permute.xlu0 %1683  ;;  %v1588_v55 = vrot.slane %v3023_v52, 3  ;;  %v1650_v30 = vmul.f32 %v1634_v18, %v1618_v53 }
 0x326   :  { %v1702_v25 = vsel %vm244_vm5, %v3049_v20, %v1686_v61 }
 0x327   :  { %v1538_v43 = vadd.f32 %v1530_v31, %v1466_v13  ;;  %v1539_v10 = vadd.f32 %v1531_v4, %v1467_v28  ;;  %v1564_v39 = vpop.permute.xlu1 %1563  ;;  %v1516_v13 = vrot.slane %v3023_v52, 2  ;;  %v1651_v28 = vmul.f32 %v1635_v12, %v1619_v41 }
 0x328   :  { %v1582_v33 = vsel %vm219_vm2, %v1564_v39, %v1566_v29  ;;  %v1583_v49 = vsel %vm219_vm2, %v3003_v58, %v1564_v39  ;;  %v1636_v29 = vrot.slane %v3023_v52, 4  ;;  %v1778_v41 = vrot.slane %v2060_v26, 6 }
 0x329   :  { %v1602_v62 = vmul.f32 %v1586_v6, %v1583_v49  ;;  %v1603_v14 = vmul.f32 %v1587_v16, %v1582_v33  ;;  %v3064_v0 = vpop.permute.xlu0 %1687  ;;  %v1722_v16 = vmul.f32 %v1706_v34, %v1702_v25  ;;  %v1779_v12 = vrot.slane %v3012_v42, 6 }
 0x32a   :  { %v1701_v45 = vsel %vm244_vm5, %v1686_v61, %v3064_v0  ;;  %v1851_v25 = vrot.slane %v3012_v42, 7 }
 0x32b   :  { %v1610_v31 = vadd.f32 %v1602_v62, %v1538_v43  ;;  %v1611_v4 = vadd.f32 %v1603_v14, %v1539_v10  ;;  %v1496_v6 = vpop.permute.xlu1 %1495  ;;  %v1723_v49 = vmul.f32 %v1707_v44, %v1701_v45  ;;  %v1604_v10 = vmul.f32 %v1588_v55, %v1581_v56 }
 0x32c   :  { %v1509_v39 = vsel %vm194_vm3, %v2995_v3, %v1496_v6  ;;  %v1850_v45 = vrot.slane %v2060_v26, 7 }
 0x32d   :  { %v1658_v33 = vadd.f32 %v1650_v30, %v1610_v31  ;;  %v1659_v61 = vadd.f32 %v1651_v28, %v1611_v4  ;;  %v1532_v54 = vmul.f32 %v1516_v13, %v1509_v39  ;;  %v3077_v19 = vpop.permute.xlu0 %1755  ;;  %v1652_v30 = vmul.f32 %v1636_v29, %v1620_v48 }
 0x32e   :  { %v1774_v43 = vsel %vm269_vm8, %v3077_v19, %v3007_v35 }
 0x32f   :  { %v1731_v53 = vadd.f32 %v1723_v49, %v1659_v61  ;;  %v1540_v18 = vadd.f32 %v1532_v54, %v1468_v47  ;;  %v1730_v3 = vadd.f32 %v1722_v16, %v1658_v33  ;;  %v3084_v34 = vpop.permute.xlu1 %1759  ;;  %v1794_v62 = vmul.f32 %v1778_v41, %v1774_v43 }
 0x330   :  { %v1773_v14 = vsel %vm269_vm8, %v3007_v35, %v3084_v34  ;;  %v1445_v49 = vrot.slane %v2790_v36, 1 }
 0x331   :  { %v1612_v44 = vadd.f32 %v1604_v10, %v1540_v18  ;;  %v1795_v13 = vmul.f32 %v1779_v12, %v1773_v14  ;;  %v3090_v28 = vpop.permute.xlu0 %1831  ;;  %v1802_v31 = vadd.f32 %v1794_v62, %v1730_v3 }
 0x332   :  { %v1845_v42 = vsel %vm294_vm9, %v3028_v21, %v3090_v28 }
 0x333   :  { %v1803_v56 = vadd.f32 %v1795_v13, %v1731_v53  ;;  %v1867_v47 = vmul.f32 %v1851_v25, %v1845_v42  ;;  %v3096_v55 = vpop.permute.xlu1 %1827  ;;  %v1660_v4 = vadd.f32 %v1652_v30, %v1612_v44  ;;  %v1708_v13 = vrot.slane %v3023_v52, 5  ;;  %v3148_v42 = vld [vmem:[#allocation6] sm:$0xff] }
 0x334   :  { %v1846_v35 = vsel %vm294_vm9, %v3096_v55, %v3028_v21 }
 0x335   :  { %v3102_v16 = vadd.f32 %v1867_v47, %v1803_v56  ;;  %v1866_v26 = vmul.f32 %v1850_v45, %v1846_v35  ;;  %v3104_v48 = vpop.permute.xlu0 %1883  ;;  %v1633_v56 = vrot.slane %v3148_v42, 4  ;;  %v1617_v35 = vrot.slane %v2850_v50, 4 }
 0x336   :  { %v1624_v50 = vrot.slane %v2934_v60, 4 }
 0x337   :  { %v3106_v29 = vadd.f32 %v1866_v26, %v1802_v31  ;;  %v3108_v39 = vpop.permute.xlu1 %1881  ;;  %v1589_v31 = vrot.slane %v2790_v36, 3  ;;  %v1637_v26 = vrot.slane %v2790_v36, 4 }
 0x339   :  { %v3110_v41 = vpop.permute.xlu0 %1353 }
 0x33a   :  { %v1364_v21 = vsel %vm144_vm1, %v2985_v2, %v3110_v41  ;;  %v1517_v2 = vrot.slane %v2790_v36, 2 }
 0x33b   :  { %v3112_v12 = vpop.permute.xlu1 %1885  ;;  %v1373_v25 = vmul.f32 %v1364_v21, %v2790_v36  ;;  %v3169_v36 = vld [vmem:[#allocation6 + $0x38] sm:$0xff] }
 0x33d   :  { %v3114_v33 = vpop.permute.xlu0 %1357 }
 0x33f   :  { %v3116_v61 = vpop.permute.xlu1 %1887 }
 0x340   :  { %3509 = vst [vmem:[#allocation12_spill] sm:$0xff] %v3116_v61 }
 0x341   :  { %v3123_v54 = vpop.permute.xlu0 %1417 }
 0x342   :  { %v1428_v43 = vsel %vm169_vm0, %v3030_v23, %v3123_v54 }
 0x343   :  { %v1461_v10 = vmul.f32 %v1445_v49, %v1428_v43  ;;  %v3130_v53 = vpop.permute.xlu1 %1355  ;;  %v3157_v49 = vld [vmem:[#allocation6 + $0x30] sm:$0xff] }
 0x345   :  { %v1469_v18 = vadd.f32 %v1461_v10, %v1373_v25  ;;  %v3132_v3 = vpop.permute.xlu0 %1421  ;;  %v1621_v10 = vrot.slane %v2916_v46, 4  ;;  %v1638_v46 = vrot.slane %v2788_v5, 4 }
 0x347   :  { %v3134_v62 = vpop.permute.xlu1 %1359  ;;  %v1653_v15 = vmul.f32 %v1637_v26, %v1621_v10 }
 0x349   :  { %v3136_v14 = vpop.permute.xlu0 %1501 }
 0x34b   :  { %v3139_v44 = vpop.permute.xlu1 %1497 }
 0x34c   :  { %v1508_v23 = vsel %vm194_vm3, %v1496_v6, %v3139_v44  ;;  %v1639_v6 = vrot.slane %v3157_v49, 4 }
 0x34d   :  { %v1533_v45 = vmul.f32 %v1517_v2, %v1508_v23  ;;  %v3145_v30 = vpop.permute.xlu0 %1689  ;;  %v1623_v2 = vrot.slane %v2921_v27, 4  ;;  %v1640_v23 = vrot.slane %v3169_v36, 4  ;;  %v1441_v27 = vrot.slane %v3148_v42, 1 }
 0x34e   :  { %v1700_v47 = vsel %vm244_vm5, %v3064_v0, %v3145_v30 }
 0x34f   :  { %v1541_v21 = vadd.f32 %v1533_v45, %v1469_v18  ;;  %v1724_v43 = vmul.f32 %v1708_v13, %v1700_v47  ;;  %v3160_v25 = vpop.permute.xlu1 %1569  ;;  %v1622_v45 = vrot.slane %v2928_v59, 4  ;;  %v3177_v47 = vmul.f32 %v1633_v56, %v1617_v35 }
 0x350   :  { %v1580_v0 = vsel %vm219_vm2, %v3036_v57, %v3160_v25  ;;  %v3182_v11 = vmul.f32 %v1639_v6, %v1623_v2  ;;  %v3188_v59 = vstv %s3499_s8  ;;  %v3200_v35 = vmul.f32 %v1640_v23, %v1624_v50 }
 0x351   :  { %v1732_v22 = vadd.f32 %v1724_v43, %v1660_v4  ;;  %v1605_v18 = vmul.f32 %v1589_v31, %v1580_v0  ;;  %v3172_v13 = vpop.permute.xlu0 %1693  ;;  %v3193_v31 = vld [vmem:[%s3492_s1] sm:$0xff]  ;;  %v3212_v10 = vmul.f32 %v1638_v46, %v1622_v45  ;;  %v1852_v2 = vrot.slane %v3023_v52, 7  ;;  %v2066_v0 = vld [vmem:[#allocation6 + $0x50] sm:$0x1]  ;;  %s2154_s1 = smov [#allocation8]  }
 0x352   :  { %3510 = vst [vmem:[#allocation13_spill] sm:$0xff] %v3182_v11  ;;  %v3198_v56 = vrot.slane %v3193_v31, %v92_v9  ;;  %3511 = vst [vmem:[#allocation14_spill] sm:$0xff] %v3200_v35  ;;  %v3205_v26 = vrot.slane %v3193_v31, %v96_v8  ;;  %v1902_v9 = vsel %vm319_vm11, %v3104_v48, %v3112_v12  ;;  %v2065_v8 = vld [vmem:[#allocation6 + $0x48] sm:$0x1]  ;;  %v3514_v57 = vsub.s32 0, %v2212_v1  ;;  %s2002_s8 = sshll.u32 %s2154_s1, 4  ;;  %s2003_s8 = int_to_ptr.vmem [resolvable:$true] %s2002_s8 }
 0x353   :  { %v1613_v24 = vadd.f32 %v1605_v18, %v1541_v21  ;;  %v3180_v60 = vpop.permute.xlu1 %1573  ;;  %v1780_v21 = vrot.slane %v3023_v52, 6  ;;  %3513 = vst [vmem:[#allocation16_spill] sm:$0xff] %v3212_v10  ;;  %v1901_v50 = vsel %vm319_vm11, %v3112_v12, %v3116_v61  ;;  %v1446_v18 = vrot.slane %v2788_v5, 1  ;;  %v3243_v61 = vld [vmem:[#allocation6 + $0x20] sm:$0xff]  ;;  %v3246_v35 = vld [vmem:[#allocation6 + $0x28] sm:$0xff]  ;;  %s2115_s24 = scalar_lea.vmem %s2003_s8, 16  ;;  %p2120_p11 = scmp.lt.s32.totalorder %s2003_s8, %s2003_s8 }
 0x354   :  { %v1447_v12 = vrot.slane %v3157_v49, 1  ;;  %v1907_v17 = vmul.f32 %v2066_v0, %v1901_v50  ;;  %v1590_v0 = vrot.slane %v3246_v35, 3  ;;  %v1591_v50 = vrot.slane %v3157_v49, 3  ;;  %p2116_p10 = scmp.ne.s32.totalorder %s2003_s8, %s2115_s24  ;;  %s2119_s25 = scalar_lea.vmem %s2003_s8, 32 }
 0x355   :  { %v3207_v6 = vpop.permute.xlu0 %1833  ;;  %v3210_v43 = vadd.f32 %v1653_v15, %v1613_v24  ;;  %v1906_v24 = vmul.f32 %v2065_v8, %v1902_v9  ;;  %p2121_p12 = scmp.lt.s32.totalorder %s2119_s25, %s2115_s24 }
 0x356   :  { %3512 = vst [vmem:[#allocation15_spill] sm:$0xff] %v3207_v6  ;;  %v1844_v52 = vsel %vm294_vm9, %v3090_v28, %v3207_v6  ;;  %v1448_v28 = vrot.slane %v3169_v36, 1 }
 0x357   :  { %v3225_v15 = vpop.permute.xlu1 %1761  ;;  %v1868_v6 = vmul.f32 %v1852_v2, %v1844_v52  ;;  %v1914_v11 = vadd.f32 %v1906_v24, %v3106_v29  ;;  %v1915_v52 = vadd.f32 %v1907_v17, %v3102_v16  ;;  %v1703_v29 = vsel %vm244_vm5, %v2999_v38, %v3049_v20  ;;  %p2122_p13 = por %p2121_p12, %p2120_p11 }
 0x358   :  { %v1772_v45 = vsel %vm269_vm8, %v3084_v34, %v3225_v15  ;;  %v3270_v34 = vrot.slane %v3193_v31, %v3514_v57  ;;  %v1362_v57 = vsel %vm144_vm1, %v3130_v53, %v3114_v33  ;;  %v1363_v20 = vsel %vm144_vm1, %v3110_v41, %v3130_v53 }
 0x359   :  { %v1796_v4 = vmul.f32 %v1780_v21, %v1772_v45  ;;  %v1504_v23 = vpop.permute.xlu0 %1503  ;;  %v1775_v16 = vsel %vm269_vm8, %v3005_v32, %v3077_v19  ;;  %v1847_v17 = vsel %vm294_vm9, %v3009_v51, %v3096_v55  ;;  %v1903_v41 = vsel %vm319_vm11, %v3108_v39, %v3104_v48  ;;  %p2123_p0 = pnand %p2122_p13, %p2116_p10 }
 0x35a   :  { %v1924_v53 = vadd.f32 %v3188_v59, %v1914_v11  ;;  %v1361_v19 = vsel %vm144_vm1, %v3114_v33, %v3134_v62  ;;  %v1368_v55 = vsel %vm144_vm1, %v3134_v62, %v2977_v63  ;;  %v1375_v48 = vmul.f32 %v3157_v49, %v1362_v57 }
 0x35b   :  { %v1804_v9 = vadd.f32 %v1796_v4, %v1732_v22  ;;  %v3249_v21 = vpop.permute.xlu1 %1765  ;;  %v1374_v4 = vmul.f32 %v3246_v35, %v1363_v20  ;;  %v1512_v11 = vsel %vm194_vm3, %v1504_v23, %v3001_v7  ;;  %v1369_v7 = vmul.f32 %v3148_v42, %v1368_v55 }
 0x35c   :  { %v1505_v20 = vsel %vm194_vm3, %v3136_v14, %v1504_v23 }
 0x35d   :  { %v3258_v10 = vpop.permute.xlu0 %1575  ;;  %v3262_v2 = vadd.f32 %v1868_v6, %v1804_v9  ;;  %v3515_v6 = vsub.s32 3, %v2212_v1 }
 0x35f   :  { %v1420_v24 = vpop.permute.xlu1 %1419  ;;  %v3279_v9 = vrot.slane %v3193_v31, %v3515_v6 }
 0x360   :  { %v1426_v8 = vsel %vm169_vm0, %v1420_v24, %v3132_v3  ;;  %v1427_v6 = vsel %vm169_vm0, %v3123_v54, %v1420_v24  ;;  %v1925_v54 = vadd.f32 %v3188_v59, %v1915_v52 }
 0x361   :  { %v1500_v45 = vpop.permute.xlu0 %1499  ;;  %v1462_v24 = vmul.f32 %v1446_v18, %v1427_v6  ;;  %v1463_v52 = vmul.f32 %v1447_v12, %v1426_v8  ;;  %v1376_v18 = vmul.f32 %v3169_v36, %v1361_v19  ;;  %v3517_v6 = vrot.slane %v2788_v5, 2 }
 0x362   :  { %v1506_v33 = vsel %vm194_vm3, %v1500_v45, %v3136_v14  ;;  %v1507_v46 = vsel %vm194_vm3, %v3139_v44, %v1500_v45  ;;  %v3516_v44 = vrot.slane %v3148_v42, 2  ;;  %v3519_v14 = vrot.slane %v3148_v42, 5 }
 0x363   :  { %v1424_v22 = vpop.permute.xlu1 %1423  ;;  %v1534_v19 = vmul.f32 %v3517_v6, %v1507_v46  ;;  %v3522_v5 = vrot.slane %v3148_v42, 7 }
 0x364   :  { %v1425_v63 = vsel %vm169_vm0, %v3132_v3, %v1424_v22  ;;  %v1432_v62 = vsel %vm169_vm0, %v1424_v22, %v2992_v37  ;;  %v1529_v45 = vmul.f32 %v3516_v44, %v1512_v11  ;;  %v1584_v3 = vsel %vm219_vm2, %v3258_v10, %v3003_v58 }
 0x365   :  { %v1457_v12 = vmul.f32 %v1441_v27, %v1432_v62  ;;  %v1464_v8 = vmul.f32 %v1448_v28, %v1425_v63  ;;  %v1692_v57 = vpop.permute.xlu0 %1691  ;;  %v1470_v37 = vadd.f32 %v1462_v24, %v1374_v4  ;;  %v1471_v22 = vadd.f32 %v1463_v52, %v1375_v48 }
 0x366   :  { %v3518_v27 = vrot.slane %v3157_v49, 2  ;;  %v1721_v23 = vmul.f32 %v3519_v14, %v1703_v29  ;;  %v3520_v11 = vrot.slane %v3148_v42, 6  ;;  %v3521_v58 = vsub.s32 4, %v2212_v1 }
 0x367   :  { %v1465_v55 = vadd.f32 %v1457_v12, %v1369_v7  ;;  %v3351_v63 = vpop.permute.xlu1 %1837  ;;  %v1472_v44 = vadd.f32 %v1464_v8, %v1376_v18  ;;  %v1865_v46 = vmul.f32 %v3522_v5, %v1847_v17  ;;  %v3523_v24 = vrot.slane %v3148_v42, 3  ;;  %v2069_v7 = vld [vmem:[#allocation6 + $0x40] sm:$0x1] }
 0x368   :  { %v1535_v28 = vmul.f32 %v3518_v27, %v1506_v33  ;;  %v1793_v62 = vmul.f32 %v3520_v11, %v1775_v16  ;;  %v3360_v4 = vrot.slane %v3193_v31, %v3521_v58  ;;  %v1699_v29 = vsel %vm244_vm5, %v3145_v30, %v1692_v57 }
 0x369   :  { %v1601_v48 = vmul.f32 %v3523_v24, %v1584_v3  ;;  %v1537_v52 = vadd.f32 %v1529_v45, %v1465_v55  ;;  %v1696_v33 = vpop.permute.xlu0 %1695  ;;  %v1905_v16 = vmul.f32 %v2069_v7, %v1903_v41  ;;  %v1973_v18 = vsub.f32 %v1924_v53, %v3198_v56 }
 0x36a   :  { %v1974_v12 = vsub.f32 %v1925_v54, %v3205_v26  ;;  %v3524_v8 = vrot.slane %v3169_v36, 2  ;;  %v1577_v42 = vsel %vm219_vm2, %v3180_v60, %v3258_v10  ;;  %v1542_v17 = vadd.f32 %v1534_v19, %v1470_v37 }
 0x36b   :  { %v1543_v45 = vadd.f32 %v1535_v28, %v1471_v22  ;;  %v1609_v3 = vadd.f32 %v1601_v48, %v1537_v52  ;;  %v1572_v27 = vpop.permute.xlu1 %1571  ;;  %v3525_v55 = vrot.slane %v3243_v61, 5  ;;  %v1698_v10 = vsel %vm244_vm5, %v1692_v57, %v3172_v13  ;;  %v3529_v52 = vld [vmem:[#allocation16_spill] sm:$0xff] }
 0x36c   :  { %v1536_v6 = vmul.f32 %v3524_v8, %v1505_v20  ;;  %v1578_v56 = vsel %vm219_vm2, %v1572_v27, %v3180_v60  ;;  %v1579_v26 = vsel %vm219_vm2, %v3160_v25, %v1572_v27  ;;  %v3393_v22 = vmul.f32 %v1973_v18, %v1973_v18  ;;  %v3532_v8 = vld [vmem:[#allocation13_spill] sm:$0xff] }
 0x36d   :  { %v1725_v41 = vmul.f32 %v3525_v55, %v1699_v29  ;;  %v1657_v53 = vadd.f32 %v3177_v47, %v1609_v3  ;;  %v1606_v54 = vmul.f32 %v1590_v0, %v1579_v26  ;;  %v1607_v20 = vmul.f32 %v1591_v50, %v1578_v56  ;;  %v1836_v37 = vpop.permute.xlu0 %1835  ;;  %v3535_v26 = vld [vmem:[#allocation12_spill] sm:$0xff] }
 0x36e   :  { %v1544_v30 = vadd.f32 %v1536_v6, %v1472_v44  ;;  %v3395_v60 = vmul.f32 %v1974_v12, %v1974_v12  ;;  %v3526_v19 = vrot.slane %v3169_v36, 3  ;;  %v1697_v47 = vsel %vm244_vm5, %v3172_v13, %v1696_v33  ;;  %v3533_v6 = vld [vmem:[#allocation15_spill] sm:$0xff] }
 0x36f   :  { %v1729_v28 = vadd.f32 %v1721_v23, %v1657_v53  ;;  %v1704_v0 = vsel %vm244_vm5, %v1696_v33, %v2999_v38  ;;  %v1614_v57 = vadd.f32 %v1606_v54, %v1542_v17  ;;  %v1615_v14 = vadd.f32 %v1607_v20, %v1543_v45  ;;  %v1764_v50 = vpop.permute.xlu1 %1763 }
 0x370   :  { %v1608_v25 = vmul.f32 %v3526_v19, %v1577_v42  ;;  %v3527_v11 = vrot.slane %v3246_v35, 5  ;;  %v1733_v58 = vadd.f32 %v1725_v41, %v3210_v43  ;;  %v1771_v24 = vsel %vm269_vm8, %v3225_v15, %v1764_v50 }
 0x371   :  { %v1801_v48 = vadd.f32 %v1793_v62, %v1729_v28  ;;  %v3528_v13 = vrot.slane %v3157_v49, 5  ;;  %v1662_v29 = vadd.f32 %v3529_v52, %v1614_v57  ;;  %v3530_v38 = vrot.slane %v3243_v61, 6  ;;  %v1768_v7 = vpop.permute.xlu0 %1767 }
 0x372   :  { %v1726_v44 = vmul.f32 %v3527_v11, %v1698_v10  ;;  %v1616_v5 = vadd.f32 %v1608_v25, %v1544_v30  ;;  %v3531_v18 = vrot.slane %v3169_v36, 5  ;;  %v1663_v43 = vadd.f32 %v3532_v8, %v1615_v14  ;;  %v3534_v30 = vld [vmem:[#allocation14_spill] sm:$0xff]  ;;  %v2071_v11 = vld [vmem:[#allocation6 + $0x60] sm:$0x1] }
 0x373   :  { %v1727_v23 = vmul.f32 %v3528_v13, %v1697_v47  ;;  %v1797_v33 = vmul.f32 %v3530_v38, %v1771_v24  ;;  %v1843_v42 = vsel %vm294_vm9, %v3533_v6, %v1836_v37  ;;  %v1770_v15 = vsel %vm269_vm8, %v1764_v50, %v3249_v21  ;;  %v1890_v27 = vpop.permute.xlu1 %1889 }
 0x374   :  { %v1728_v12 = vmul.f32 %v3531_v18, %v1704_v0  ;;  %v1873_v62 = vadd.f32 %v1865_v46, %v1801_v48  ;;  %v1769_v45 = vsel %vm269_vm8, %v3249_v21, %v1768_v7  ;;  %v1776_v3 = vsel %vm269_vm8, %v1768_v7, %v3005_v32  ;;  %v2070_v32 = vld [vmem:[#allocation6 + $0x58] sm:$0x1] }
 0x375   :  { %v1805_v17 = vadd.f32 %v1797_v33, %v1733_v58  ;;  %v1664_v55 = vadd.f32 %v3534_v30, %v1616_v5  ;;  %v1842_v41 = vsel %vm294_vm9, %v1836_v37, %v3351_v63  ;;  %v1734_v56 = vadd.f32 %v1726_v44, %v1662_v29  ;;  %v1892_v25 = vpop.permute.xlu0 %1891  ;;  %v2073_v30 = vld [vmem:[#allocation6 + $0x70] sm:$0x1] }
 0x376   :  { %v1900_v46 = vsel %vm319_vm11, %v3535_v26, %v1890_v27  ;;  %v1913_v53 = vadd.f32 %v1905_v16, %v1873_v62  ;;  %v3536_v10 = vrot.slane %v3243_v61, 7  ;;  %v3537_v54 = vrot.slane %v3246_v35, 6  ;;  %v2072_v62 = vld [vmem:[#allocation6 + $0x68] sm:$0x1] }
 0x377   :  { %v1908_v19 = vmul.f32 %v2070_v32, %v1900_v46  ;;  %v1735_v47 = vadd.f32 %v1727_v23, %v1663_v43  ;;  %v3538_v28 = vrot.slane %v3157_v49, 6  ;;  %v3539_v37 = vrot.slane %v3169_v36, 6  ;;  %v1840_v58 = vpop.permute.xlu1 %1839  ;;  %v2074_v46 = vld [vmem:[#allocation6 + $0x78] sm:$0x1] }
 0x378   :  { %v1869_v21 = vmul.f32 %v3536_v10, %v1843_v42  ;;  %v1798_v20 = vmul.f32 %v3537_v54, %v1770_v15  ;;  %v1899_v14 = vsel %vm319_vm11, %v1890_v27, %v1892_v25  ;;  %v1923_v16 = vadd.f32 %v3188_v59, %v1913_v53 }
 0x379   :  { %v1799_v0 = vmul.f32 %v3538_v28, %v1769_v45  ;;  %v1800_v57 = vmul.f32 %v3539_v37, %v1776_v3  ;;  %v1916_v61 = vadd.f32 %v1908_v19, %v3262_v2  ;;  %v1909_v44 = vmul.f32 %v2071_v11, %v1899_v14  ;;  %v1894_v33 = vpop.permute.xlu0 %1893 }
 0x37a   :  { %v1877_v50 = vadd.f32 %v1869_v21, %v1805_v17  ;;  %v1736_v5 = vadd.f32 %v1728_v12, %v1664_v55  ;;  %v1806_v24 = vadd.f32 %v1798_v20, %v1734_v56  ;;  %v1841_v48 = vsel %vm294_vm9, %v3351_v63, %v1840_v58 }
 0x37b   :  { %v1848_v13 = vsel %vm294_vm9, %v1840_v58, %v3009_v51  ;;  %v1972_v23 = vsub.f32 %v1923_v16, %v3270_v34  ;;  %v1926_v52 = vadd.f32 %v3188_v59, %v1916_v61  ;;  %v3540_v2 = vrot.slane %v3157_v49, 7  ;;  %v1896_v15 = vpop.permute.xlu1 %1895 }
 0x37c   :  { %v1917_v29 = vadd.f32 %v1909_v44, %v1877_v50  ;;  %v3541_v7 = vrot.slane %v3246_v35, 7  ;;  %v1807_v12 = vadd.f32 %v1799_v0, %v1735_v47  ;;  %v3542_v8 = vrot.slane %v3169_v36, 7 }
 0x37d   :  { %v1871_v38 = vmul.f32 %v3540_v2, %v1841_v48  ;;  %v1898_v43 = vsel %vm319_vm11, %v1892_v25, %v1894_v33  ;;  %v1808_v51 = vadd.f32 %v1800_v57, %v1736_v5  ;;  %v1980_v6 = vmul.f32 %v1972_v23, %v1972_v23 }
 0x37e   :  { %v1870_v18 = vmul.f32 %v3541_v7, %v1842_v41  ;;  %v1872_v63 = vmul.f32 %v3542_v8, %v1848_v13  ;;  %v1975_v34 = vsub.f32 %v1926_v52, %v3279_v9  ;;  %v1927_v42 = vadd.f32 %v3188_v59, %v1917_v29 }
 0x37f   :  { %v1910_v17 = vmul.f32 %v2072_v62, %v1898_v43  ;;  %v1897_v35 = vsel %vm319_vm11, %v1894_v33, %v1896_v15  ;;  %v1904_v36 = vsel %vm319_vm11, %v1896_v15, %v3108_v39  ;;  %v1988_v45 = vadd.f32 %v3393_v22, %v1980_v6 }
 0x380   :  { %v1878_v49 = vadd.f32 %v1870_v18, %v1806_v24  ;;  %v1976_v3 = vsub.f32 %v1927_v42, %v3360_v4  ;;  %v1879_v27 = vadd.f32 %v1871_v38, %v1807_v12  ;;  %v1911_v9 = vmul.f32 %v2073_v30, %v1897_v35 }
 0x381   :  { %v1880_v55 = vadd.f32 %v1872_v63, %v1808_v51  ;;  %v3543_v41 = vsub.s32 5, %v2212_v1  ;;  %v1912_v53 = vmul.f32 %v2074_v46, %v1904_v36  ;;  %v1989_v10 = vadd.f32 %v1988_v45, %v3395_v60 }
 0x382   :  { %v1918_v26 = vadd.f32 %v1910_v17, %v1878_v49  ;;  %v1983_v21 = vmul.f32 %v1975_v34, %v1975_v34  ;;  %v1919_v40 = vadd.f32 %v1911_v9, %v1879_v27  ;;  %v3544_v39 = vsub.s32 6, %v2212_v1 }
 0x383   :  { %v1955_v56 = vrot.slane %v3193_v31, %v3543_v41  ;;  %v1920_v54 = vadd.f32 %v1912_v53, %v1880_v55  ;;  %v3545_v20 = vsub.s32 7, %v2212_v1  ;;  %v1984_v25 = vmul.f32 %v1976_v3, %v1976_v3 }
 0x384   :  { %v1959_v22 = vrot.slane %v3193_v31, %v3544_v39  ;;  %v1928_v4 = vadd.f32 %v3188_v59, %v1918_v26  ;;  %v1990_v19 = vadd.f32 %v1989_v10, %v1983_v21  ;;  %v1929_v47 = vadd.f32 %v3188_v59, %v1919_v40 }
 0x385   :  { %v1963_v32 = vrot.slane %v3193_v31, %v3545_v20  ;;  %v1930_v60 = vadd.f32 %v3188_v59, %v1920_v54 }
 0x386   :  { %v1977_v28 = vsub.f32 %v1928_v4, %v1955_v56  ;;  %v1978_v0 = vsub.f32 %v1929_v47, %v1959_v22  ;;  %v1991_v37 = vadd.f32 %v1990_v19, %v1984_v25 }
 0x387   :  { %v1979_v14 = vsub.f32 %v1930_v60, %v1963_v32 }
 0x388   :  { %v1985_v57 = vmul.f32 %v1977_v28, %v1977_v28  ;;  %v1986_v16 = vmul.f32 %v1978_v0, %v1978_v0 }
 0x389   :  { %v1987_v50 = vmul.f32 %v1979_v14, %v1979_v14 }
 0x38a   :  { %v1992_v61 = vadd.f32 %v1991_v37, %v1985_v57 }
 0x38c   :  { %v1993_v11 = vadd.f32 %v1992_v61, %v1986_v16 }
 0x38e   :  { %v1994_v1 = vadd.f32 %v1993_v11, %v1987_v50 }
 0x390   :  { %1995 = vst [vmem:[#allocation8] sm:$0x1] %v1994_v1 }
 0x391   :  { %2126 = shalt.err (!%p2123_p0)
}
 0x392   :  { %2005 = dma.vmem_to_hbm [thread:$0]  %s2003_s8, 16, %s3500_s9, [#allocation5]  }
 0x393   :  { %2139 = dma.done.wait [#allocation5], 16  }
 0x394   :  { %2140 = vsyncadd [#allocation5], 4294967280 }
 0x395   :  { %2009 = vsyncpa [#allocation4], 1 }
 0x396   :  { %2010 = vsyncpa [#allocation7], 1 }
 0x397   :  { %2011 = vsyncpa [#allocation5], 1 }

</bundles_post_ra>
